<compile_context>
chip_gen: v7x
topology: tpu7x:2x2x1
jax: 0.10.0
libtpu: 0.0.40
codegen_flags: <defaults>
</compile_context>

<pallas_src>
import math
import numpy as np
import jax
import jax.numpy as jnp
from jax.experimental import pallas as pl
from jax.experimental.pallas import tpu as pltpu


def _tpu_vmem_capacity_bytes():
    """Physical per-core VMEM capacity (generation aware); conservative 64 MiB fallback."""
    try:
        return int(pltpu.get_tpu_info().vmem_capacity_bytes)
    except Exception:
        return 64 * 1024 * 1024


def _recip(x):
    """EUP reciprocal estimate + one Newton-Raphson step (~f32 accuracy, no VPU divide)."""
    r = pl.reciprocal(x, approx=True)
    return r * (2.0 - x * r)


def _choose_batch_tile(B, N):
    """Fuse a few batch elements per grid step for small clouds (amortizes ~0.35 us/step),
    capped at 4, and keep B // tb >= 2 so a v7x megacore split on the batch axis balances."""
    if N > 256 or B == 1:
        return 1
    best = 1
    for d in range(2, min(B, 4) + 1):
        if B % d == 0 and B // d >= 2:
            best = d
    return best


def _choose_row_tile(S, N, tb, vmem_cap):
    """Row tile TS for the [S, N] weight problem.  ~6 live [TS, N] f32 temporaries per fused
    batch element in the kNN loop; budget them against the actual VMEM capacity."""
    temp_budget = (16 << 20) if vmem_cap >= (100 << 20) else (6 << 20)
    cap = max(8, temp_budget // (6 * 4 * max(N, 1) * max(tb, 1)))
    cap = min(cap, 2048)
    if S <= cap:
        return S
    ts = (cap // 8) * 8
    while ts >= 8:
        if S % ts == 0:
            return ts
        ts -= 8
    # TODO(synk): ragged trailing row tiles (S with no multiple-of-8 divisor <= cap).
    return S


def _spec(shape, index_map, single_buffer=False):
    """BlockSpec; ss-invariant blocks are single-buffered (they only change at batch-tile
    boundaries, so double-buffering just doubles their VMEM footprint)."""
    if single_buffer:
        try:
            return pl.BlockSpec(shape, index_map, pipeline_mode=pl.Buffered(1))
        except Exception:
            pass
    return pl.BlockSpec(shape, index_map)


def _interp_weights(xyz1t, xyz2, nsample):
    """Row-normalized inverse-distance weights [TS, N] selecting the `nsample` nearest xyz1
    points for every xyz2 query row (knn_point + 1/(d+1e-8) weights).

    Selection loop accumulates only a 0/1 mask (one cross-lane reduce + ~3 VPU ops per
    neighbour); inverse-distance weights are applied once at the end via the EUP."""
    d = xyz2[:, 0:1] - xyz1t[0:1, :]
    sq = d * d                                       # exact squared distance, always >= 0
    for c in range(1, 3):
        d = xyz2[:, c:c + 1] - xyz1t[c:c + 1, :]
        sq = sq + d * d
    neg = -sq
    mask = None
    for _ in range(nsample):                         # small static loop
        m = jnp.max(neg, axis=-1, keepdims=True)     # one cross-lane reduce per neighbour
        sel = neg == m                               # exact ties all selected (never for random f32)
        mask = sel.astype(jnp.float32) if mask is None else mask + sel.astype(jnp.float32)
        neg = jnp.where(sel, jnp.float32(-1e30), neg)
    wmat = mask * _recip(sq + 1e-8)                  # inverse-distance weights on the EUP
    norm = jnp.sum(wmat, axis=-1, keepdims=True)     # one reduce total for the normalizer
    return wmat * _recip(norm)


def make_upsample_conv_hoisted_kernel(nsample, tb):
    """out = wmat @ (points2 @ W2) + points1 @ W1 + bias; points2 @ W2 precomputed in XLA."""
    def kernel(xyz1t_ref, xyz2_ref, p1_ref, p2w_ref, w1t_ref, b_ref, o_ref):
        def body(b, carry):
            wmat = _interp_weights(xyz1t_ref[b], xyz2_ref[b], nsample)            # [TS, N]
            acc = jnp.dot(wmat, p2w_ref[b], preferred_element_type=jnp.float32)   # [TS, Cout]
            out = (jnp.dot(p1_ref[b], w1t_ref[...], preferred_element_type=jnp.float32)
                   + acc + b_ref[...])
            o_ref[b] = out.astype(o_ref.dtype)
            return carry
        jax.lax.fori_loop(0, tb, body, 0, unroll=True)
    return kernel


def make_upsample_conv_kernel(nsample, tb):
    """out = ((wmat @ points2) @ W2) + points1 @ W1 + bias (used when Cout > D2, keeping the
    dominant [TS, N]-wide matmul at the narrower D2 width)."""
    def kernel(xyz1t_ref, xyz2_ref, p1_ref, p2_ref, w1t_ref, w2t_ref, b_ref, o_ref):
        def body(b, carry):
            wmat = _interp_weights(xyz1t_ref[b], xyz2_ref[b], nsample)
            interp = jnp.dot(wmat, p2_ref[b], preferred_element_type=jnp.float32)
            acc = jnp.dot(interp, w2t_ref[...], preferred_element_type=jnp.float32)
            out = (jnp.dot(p1_ref[b], w1t_ref[...], preferred_element_type=jnp.float32)
                   + acc + b_ref[...])
            o_ref[b] = out.astype(o_ref.dtype)
            return carry
        jax.lax.fori_loop(0, tb, body, 0, unroll=True)
    return kernel


def make_upsample_kernel(nsample, tb):
    def kernel(xyz1t_ref, xyz2_ref, p2_ref, o_ref):
        def body(b, carry):
            wmat = _interp_weights(xyz1t_ref[b], xyz2_ref[b], nsample)
            o_ref[b] = jnp.dot(wmat, p2_ref[b],
                               preferred_element_type=jnp.float32).astype(o_ref.dtype)
            return carry
        jax.lax.fori_loop(0, tb, body, 0, unroll=True)
    return kernel


def make_conv1x1_s1_kernel(tb):
    """S == 1 path: out = points1 @ W1 + broadcast(points2[:, 0] @ W2) + bias, with no
    [B, N, D2] broadcast/concat materialized in HBM."""
    def kernel(p1_ref, p2_ref, w1t_ref, w2t_ref, b_ref, o_ref):
        def body(b, carry):
            row = jnp.dot(p2_ref[b], w2t_ref[...], preferred_element_type=jnp.float32)  # [1, Cout]
            out = (jnp.dot(p1_ref[b], w1t_ref[...], preferred_element_type=jnp.float32)
                   + row + b_ref[...])
            o_ref[b] = out.astype(o_ref.dtype)
            return carry
        jax.lax.fori_loop(0, tb, body, 0, unroll=True)
    return kernel


def nearest_upsample_block(xyz1, xyz2, points1, points2, conv_w, conv_b, nsample):
    """xyz1 [B,N,3], xyz2 [B,S,3], points1 [B,N,D1] or None, points2 [B,S,D2],
    conv_w [Cout, Cin=D1+D2], conv_b [Cout] -> [B, N, Cout] (or [B, N, D2] if points1 is None)."""
    B, N, _ = xyz1.shape
    S = xyz2.shape[1]
    D2 = points2.shape[-1]
    tb = _choose_batch_tile(B, N)
    vmem_cap = _tpu_vmem_capacity_bytes()
    vmem_limit = min((vmem_cap * 3) // 4, 96 * 1024 * 1024)

    w1_t = w2_t = bias = None
    cout = None
    if points1 is not None:
        D1 = points1.shape[-1]
        cout = conv_w.shape[0]
        assert conv_w.shape[1] == D1 + D2
        # No Cout padding: at small Cout lane-dense padded stores wrote 8x the output bytes
        # plus an XLA slice re-read; masked stores are cheaper.
        # TODO(synk): expose a padded-Cout layout for downstream consumers that want it.
        w_t = conv_w.T.astype(jnp.float32)                    # [Cin, Cout]
        bias = conv_b.reshape(1, cout).astype(jnp.float32)
        w1_t, w2_t = w_t[:D1], w_t[D1:]

    if S == 1:
        # torch: points2.repeat(1, N, 1)
        if points1 is None:
            return jnp.broadcast_to(points2, (B, N, D2))
        p1 = points1.astype(jnp.float32)
        p2 = points2.astype(jnp.float32)
        return pl.pallas_call(
            make_conv1x1_s1_kernel(tb),
            out_shape=jax.ShapeDtypeStruct((B, N, cout), jnp.float32),
            grid_spec=pltpu.PrefetchScalarGridSpec(
                num_scalar_prefetch=0, grid=(B // tb,),
                in_specs=[pl.BlockSpec((tb, N, D1), lambda bb: (bb, 0, 0)),
                          pl.BlockSpec((tb, 1, D2), lambda bb: (bb, 0, 0)),
                          pl.BlockSpec((D1, cout), lambda bb: (0, 0)),
                          pl.BlockSpec((D2, cout), lambda bb: (0, 0)),
                          pl.BlockSpec((1, cout), lambda bb: (0, 0))],
                out_specs=pl.BlockSpec((tb, N, cout), lambda bb: (bb, 0, 0))),
            compiler_params=pltpu.CompilerParams(
                dimension_semantics=("parallel",),
                vmem_limit_bytes=vmem_limit),
        )(p1, p2, w1_t, w2_t, bias)

    assert S == N, "NearestUpsampleBlock (as written) requires S == N when S > 1"
    assert nsample <= N
    xyz1_t = jnp.transpose(xyz1, (0, 2, 1)).astype(jnp.float32)   # [B, 3, N]
    xyz2f = xyz2.astype(jnp.float32)
    ts = _choose_row_tile(S, N, tb, vmem_cap)
    nss = S // ts
    grid = (B // tb, nss)                                         # row-tile axis innermost
    # Keep the (v7x) megacore split on the batch axis so ss-invariant resident blocks are
    # DMA'd once per batch tile; "arbitrary" vs "parallel" is measured ~neutral on v5e/v6e.
    cparams = pltpu.CompilerParams(
        dimension_semantics=("parallel", "arbitrary"),
        vmem_limit_bytes=vmem_limit)
    inv = nss > 1   # single-buffer ss-invariant blocks only when there are several row tiles

    if points1 is None:
        cost = pl.CostEstimate(
            flops=int(B * (9 * S * N + 6 * nsample * S * N + 2 * S * N * D2)),
            transcendentals=int(B * S * (N + 1)),
            bytes_accessed=int(4 * B * (3 * N + 3 * S + S * D2 + N * D2)))
        return pl.pallas_call(
            make_upsample_kernel(nsample, tb),
            out_shape=jax.ShapeDtypeStruct((B, N, D2), jnp.float32),
            grid_spec=pltpu.PrefetchScalarGridSpec(
                num_scalar_prefetch=0, grid=grid,
                in_specs=[_spec((tb, 3, N), lambda bb, ss: (bb, 0, 0), inv),     # ss-invariant
                          _spec((tb, ts, 3), lambda bb, ss: (bb, ss, 0)),
                          _spec((tb, S, D2), lambda bb, ss: (bb, 0, 0), inv)],   # ss-invariant
                out_specs=pl.BlockSpec((tb, ts, D2), lambda bb, ss: (bb, ss, 0))),
            compiler_params=cparams,
            cost_estimate=cost,
        )(xyz1_t, xyz2f, points2.astype(jnp.float32))

    p1 = points1.astype(jnp.float32)
    hoist = cout <= D2      # hoisting narrows (or keeps) the dominant [TS, N] matmul width
    if hoist:
        # ss-invariant: compute points2 @ W2 ONCE in XLA instead of once per row tile.
        p2w = jnp.einsum('bsd,dc->bsc', points2.astype(jnp.float32), w2_t,
                         precision=jax.lax.Precision.HIGHEST)                    # [B, S, Cout]
        cost = pl.CostEstimate(
            flops=int(B * (9 * S * N + 6 * nsample * S * N
                           + 2 * S * N * cout + 2 * N * D1 * cout)),
            transcendentals=int(B * S * (N + 1)),
            bytes_accessed=int(4 * B * (3 * N + 3 * S + S * cout + N * D1 + N * cout)))
        return pl.pallas_call(
            make_upsample_conv_hoisted_kernel(nsample, tb),
            out_shape=jax.ShapeDtypeStruct((B, N, cout), jnp.float32),
            grid_spec=pltpu.PrefetchScalarGridSpec(
                num_scalar_prefetch=0, grid=grid,
                in_specs=[_spec((tb, 3, N), lambda bb, ss: (bb, 0, 0), inv),     # ss-invariant
                          _spec((tb, ts, 3), lambda bb, ss: (bb, ss, 0)),
                          _spec((tb, ts, D1), lambda bb, ss: (bb, ss, 0)),
                          _spec((tb, S, cout), lambda bb, ss: (bb, 0, 0), inv),  # ss-invariant
                          _spec((D1, cout), lambda bb, ss: (0, 0), inv),
                          _spec((1, cout), lambda bb, ss: (0, 0), inv)],
                out_specs=pl.BlockSpec((tb, ts, cout), lambda bb, ss: (bb, ss, 0))),
            compiler_params=cparams,
            cost_estimate=cost,
        )(xyz1_t, xyz2f, p1, p2w, w1_t, bias)

    cost = pl.CostEstimate(
        flops=int(B * (9 * S * N + 6 * nsample * S * N
                       + 2 * S * N * D2 + 2 * N * D2 * cout + 2 * N * D1 * cout)),
        transcendentals=int(B * S * (N + 1)),
        bytes_accessed=int(4 * B * (3 * N + 3 * S + S * D2 + N * D1 + N * cout)))
    return pl.pallas_call(
        make_upsample_conv_kernel(nsample, tb),
        out_shape=jax.ShapeDtypeStruct((B, N, cout), jnp.float32),
        grid_spec=pltpu.PrefetchScalarGridSpec(
            num_scalar_prefetch=0, grid=grid,
            in_specs=[_spec((tb, 3, N), lambda bb, ss: (bb, 0, 0), inv),         # ss-invariant
                      _spec((tb, ts, 3), lambda bb, ss: (bb, ss, 0)),
                      _spec((tb, ts, D1), lambda bb, ss: (bb, ss, 0)),
                      _spec((tb, S, D2), lambda bb, ss: (bb, 0, 0), inv),        # ss-invariant
                      _spec((D1, cout), lambda bb, ss: (0, 0), inv),
                      _spec((D2, cout), lambda bb, ss: (0, 0), inv),
                      _spec((1, cout), lambda bb, ss: (0, 0), inv)],
            out_specs=pl.BlockSpec((tb, ts, cout), lambda bb, ss: (bb, ss, 0))),
        compiler_params=cparams,
        cost_estimate=cost,
    )(xyz1_t, xyz2f, p1, points2.astype(jnp.float32), w1_t, w2_t, bias)


def reference(xyz1, xyz2, points1, points2, conv_w, conv_b, nsample):
    """Pure-JAX mirror of the PyTorch forward (knn_point + inverse-distance interp + conv)."""
    B, N, _ = xyz1.shape
    S = xyz2.shape[1]
    hp = jax.lax.Precision.HIGHEST
    if S == 1:
        interp = jnp.broadcast_to(points2, (B, N, points2.shape[-1]))
    else:
        cross = jnp.einsum('bsc,bnc->bsn', xyz2, xyz1, precision=hp)
        sqdist = (jnp.sum(xyz2 ** 2, -1)[:, :, None]
                  + jnp.sum(xyz1 ** 2, -1)[:, None, :] - 2.0 * cross)
        vals, idx = jax.lax.top_k(-sqdist, nsample)                           # [B, S, nsample]
        dists = -vals
        recip = 1.0 / (dists + 1e-8)
        weight = recip / jnp.sum(recip, axis=2, keepdims=True)
        gathered = jax.vmap(lambda p, i: p[i])(points2, idx)                  # [B, S, nsample, D2]
        interp = jnp.sum(gathered * weight[..., None], axis=2)
    if points1 is None:
        return interp
    feat = jnp.concatenate([points1, interp], axis=-1)
    return jnp.einsum('bnc,oc->bno', feat, conv_w, precision=hp) + conv_b[None, None, :]


if __name__ == "__main__":
    B, N, S = 2, 64, 64            # module requires S == N for the general (S > 1) path
    in_channel, out_channel, nsample = 16, 16, 8
    D1, D2 = out_channel, in_channel
    cin = in_channel + out_channel

    key = jax.random.PRNGKey(0)
    k1, k2, k3, k4, k5, k6 = jax.random.split(key, 6)
    xyz1 = jax.random.normal(k1, (B, N, 3), jnp.float32)
    xyz2 = jax.random.normal(k2, (B, S, 3), jnp.float32)
    points1 = jax.random.normal(k3, (B, N, D1), jnp.float32)
    points2 = jax.random.normal(k4, (B, S, D2), jnp.float32)

    # Deterministic stand-in for Conv1d kaiming_uniform init (shapes: [Cout, Cin], [Cout]).
    bound = 1.0 / math.sqrt(cin)
    conv_w = jax.random.uniform(k5, (out_channel, cin), jnp.float32, -bound, bound)
    conv_b = jax.random.uniform(k6, (out_channel,), jnp.float32, -bound, bound)

    out = nearest_upsample_block(xyz1, xyz2, points1, points2, conv_w, conv_b, nsample)
    out = jax.block_until_ready(out)

    ref = reference(xyz1, xyz2, points1, points2, conv_w, conv_b, nsample)
    assert out.shape == (B, N, out_channel), out.shape
    err = float(np.max(np.abs(np.asarray(out) - np.asarray(ref))))
    assert np.allclose(np.asarray(out), np.asarray(ref), atol=2e-4, rtol=2e-4), (
        "max abs err = %g" % err)
    print("KERNEL_OK")
</pallas_src>

<mosaic_0001>
module attributes {stable_mosaic.version = 11 : i64} {
  func.func @kernel(%arg0: i32, %arg1: i32, %arg2: memref<1x3x64xf32, #tpu.memory_space<vmem>>, %arg3: memref<1x64x3xf32, #tpu.memory_space<vmem>>, %arg4: memref<1x64x16xf32, #tpu.memory_space<vmem>>, %arg5: memref<1x64x16xf32, #tpu.memory_space<vmem>>, %arg6: memref<16x16xf32, #tpu.memory_space<vmem>>, %arg7: memref<1x16xf32, #tpu.memory_space<vmem>>, %arg8: memref<1x64x16xf32, #tpu.memory_space<vmem>>) attributes {dimension_semantics = [#tpu.dimension_semantics<parallel>, #tpu.dimension_semantics<arbitrary>], iteration_bounds = array<i64: 2, 1>, scalar_prefetch = 0 : i64, scratch_operands = 0 : i64, tpu.core_type = #tpu.core_type<tc>, window_params = [{transform_indices = @transform_0, window_bounds = array<i64: 1, 3, 64>}, {transform_indices = @transform_1, window_bounds = array<i64: 1, 64, 3>}, {transform_indices = @transform_2, window_bounds = array<i64: 1, 64, 16>}, {transform_indices = @transform_3, window_bounds = array<i64: 1, 64, 16>}, {pipeline_mode = #tpu.pipeline_mode<synchronous>, transform_indices = @transform_4, window_bounds = array<i64: 16, 16>}, {pipeline_mode = #tpu.pipeline_mode<synchronous>, transform_indices = @transform_5, window_bounds = array<i64: 1, 16>}, {transform_indices = @transform_6, window_bounds = array<i64: 1, 64, 16>}]} {
    %c0_i32 = arith.constant 0 : i32
    %0 = arith.index_cast %c0_i32 : i32 to index
    %c0 = arith.constant 0 : index
    %c0_0 = arith.constant 0 : index
    %1 = vector.load %arg2[%0, %c0, %c0_0] : memref<1x3x64xf32, #tpu.memory_space<vmem>>, vector<1x3x64xf32>
    %2 = vector.shape_cast %1 : vector<1x3x64xf32> to vector<3x64xf32>
    %3 = arith.index_cast %c0_i32 : i32 to index
    %c0_1 = arith.constant 0 : index
    %c0_2 = arith.constant 0 : index
    %4 = vector.load %arg3[%3, %c0_1, %c0_2] : memref<1x64x3xf32, #tpu.memory_space<vmem>>, vector<1x64x3xf32>
    %5 = vector.shape_cast %4 : vector<1x64x3xf32> to vector<64x3xf32>
    %6 = vector.extract_strided_slice %5 {offsets = [0, 0], sizes = [64, 1], strides = [1, 1]} : vector<64x3xf32> to vector<64x1xf32>
    %7 = vector.extract_strided_slice %2 {offsets = [0, 0], sizes = [1, 64], strides = [1, 1]} : vector<3x64xf32> to vector<1x64xf32>
    %8 = vector.broadcast %6 : vector<64x1xf32> to vector<64x64xf32>
    %9 = vector.broadcast %7 : vector<1x64xf32> to vector<64x64xf32>
    %10 = arith.subf %8, %9 : vector<64x64xf32>
    %11 = arith.mulf %10, %10 : vector<64x64xf32>
    %12 = vector.extract_strided_slice %5 {offsets = [0, 1], sizes = [64, 1], strides = [1, 1]} : vector<64x3xf32> to vector<64x1xf32>
    %13 = vector.extract_strided_slice %2 {offsets = [1, 0], sizes = [1, 64], strides = [1, 1]} : vector<3x64xf32> to vector<1x64xf32>
    %14 = vector.broadcast %12 : vector<64x1xf32> to vector<64x64xf32>
    %15 = vector.broadcast %13 : vector<1x64xf32> to vector<64x64xf32>
    %16 = arith.subf %14, %15 : vector<64x64xf32>
    %17 = arith.mulf %16, %16 : vector<64x64xf32>
    %18 = arith.addf %11, %17 : vector<64x64xf32>
    %19 = vector.extract_strided_slice %5 {offsets = [0, 2], sizes = [64, 1], strides = [1, 1]} : vector<64x3xf32> to vector<64x1xf32>
    %20 = vector.extract_strided_slice %2 {offsets = [2, 0], sizes = [1, 64], strides = [1, 1]} : vector<3x64xf32> to vector<1x64xf32>
    %21 = vector.broadcast %19 : vector<64x1xf32> to vector<64x64xf32>
    %22 = vector.broadcast %20 : vector<1x64xf32> to vector<64x64xf32>
    %23 = arith.subf %21, %22 : vector<64x64xf32>
    %24 = arith.mulf %23, %23 : vector<64x64xf32>
    %25 = arith.addf %18, %24 : vector<64x64xf32>
    %cst = arith.constant 0.000000e+00 : f32
    %26 = vector.broadcast %cst : f32 to vector<64x64xf32>
    %27 = arith.subf %26, %25 : vector<64x64xf32>
    %cst_3 = arith.constant dense<0xFF800000> : vector<64xf32>
    %28 = vector.multi_reduction <maximumf>, %27, %cst_3 [1] : vector<64x64xf32> to vector<64xf32>
    %29 = vector.shape_cast %28 : vector<64xf32> to vector<64x1xf32>
    %30 = vector.broadcast %29 : vector<64x1xf32> to vector<64x64xf32>
    %31 = arith.cmpf oeq, %27, %30 : vector<64x64xf32>
    %32 = arith.extui %31 : vector<64x64xi1> to vector<64x64xi32>
    %33 = arith.sitofp %32 : vector<64x64xi32> to vector<64x64xf32>
    %cst_4 = arith.constant -1.000000e+30 : f32
    %34 = vector.broadcast %cst_4 : f32 to vector<64x64xf32>
    %35 = arith.select %31, %34, %27 : vector<64x64xi1>, vector<64x64xf32>
    %cst_5 = arith.constant dense<0xFF800000> : vector<64xf32>
    %36 = vector.multi_reduction <maximumf>, %35, %cst_5 [1] : vector<64x64xf32> to vector<64xf32>
    %37 = vector.shape_cast %36 : vector<64xf32> to vector<64x1xf32>
    %38 = vector.broadcast %37 : vector<64x1xf32> to vector<64x64xf32>
    %39 = arith.cmpf oeq, %35, %38 : vector<64x64xf32>
    %40 = arith.extui %39 : vector<64x64xi1> to vector<64x64xi32>
    %41 = arith.sitofp %40 : vector<64x64xi32> to vector<64x64xf32>
    %42 = arith.addf %33, %41 : vector<64x64xf32>
    %cst_6 = arith.constant -1.000000e+30 : f32
    %43 = vector.broadcast %cst_6 : f32 to vector<64x64xf32>
    %44 = arith.select %39, %43, %35 : vector<64x64xi1>, vector<64x64xf32>
    %cst_7 = arith.constant dense<0xFF800000> : vector<64xf32>
    %45 = vector.multi_reduction <maximumf>, %44, %cst_7 [1] : vector<64x64xf32> to vector<64xf32>
    %46 = vector.shape_cast %45 : vector<64xf32> to vector<64x1xf32>
    %47 = vector.broadcast %46 : vector<64x1xf32> to vector<64x64xf32>
    %48 = arith.cmpf oeq, %44, %47 : vector<64x64xf32>
    %49 = arith.extui %48 : vector<64x64xi1> to vector<64x64xi32>
    %50 = arith.sitofp %49 : vector<64x64xi32> to vector<64x64xf32>
    %51 = arith.addf %42, %50 : vector<64x64xf32>
    %cst_8 = arith.constant -1.000000e+30 : f32
    %52 = vector.broadcast %cst_8 : f32 to vector<64x64xf32>
    %53 = arith.select %48, %52, %44 : vector<64x64xi1>, vector<64x64xf32>
    %cst_9 = arith.constant dense<0xFF800000> : vector<64xf32>
    %54 = vector.multi_reduction <maximumf>, %53, %cst_9 [1] : vector<64x64xf32> to vector<64xf32>
    %55 = vector.shape_cast %54 : vector<64xf32> to vector<64x1xf32>
    %56 = vector.broadcast %55 : vector<64x1xf32> to vector<64x64xf32>
    %57 = arith.cmpf oeq, %53, %56 : vector<64x64xf32>
    %58 = arith.extui %57 : vector<64x64xi1> to vector<64x64xi32>
    %59 = arith.sitofp %58 : vector<64x64xi32> to vector<64x64xf32>
    %60 = arith.addf %51, %59 : vector<64x64xf32>
    %cst_10 = arith.constant -1.000000e+30 : f32
    %61 = vector.broadcast %cst_10 : f32 to vector<64x64xf32>
    %62 = arith.select %57, %61, %53 : vector<64x64xi1>, vector<64x64xf32>
    %cst_11 = arith.constant dense<0xFF800000> : vector<64xf32>
    %63 = vector.multi_reduction <maximumf>, %62, %cst_11 [1] : vector<64x64xf32> to vector<64xf32>
    %64 = vector.shape_cast %63 : vector<64xf32> to vector<64x1xf32>
    %65 = vector.broadcast %64 : vector<64x1xf32> to vector<64x64xf32>
    %66 = arith.cmpf oeq, %62, %65 : vector<64x64xf32>
    %67 = arith.extui %66 : vector<64x64xi1> to vector<64x64xi32>
    %68 = arith.sitofp %67 : vector<64x64xi32> to vector<64x64xf32>
    %69 = arith.addf %60, %68 : vector<64x64xf32>
    %cst_12 = arith.constant -1.000000e+30 : f32
    %70 = vector.broadcast %cst_12 : f32 to vector<64x64xf32>
    %71 = arith.select %66, %70, %62 : vector<64x64xi1>, vector<64x64xf32>
    %cst_13 = arith.constant dense<0xFF800000> : vector<64xf32>
    %72 = vector.multi_reduction <maximumf>, %71, %cst_13 [1] : vector<64x64xf32> to vector<64xf32>
    %73 = vector.shape_cast %72 : vector<64xf32> to vector<64x1xf32>
    %74 = vector.broadcast %73 : vector<64x1xf32> to vector<64x64xf32>
    %75 = arith.cmpf oeq, %71, %74 : vector<64x64xf32>
    %76 = arith.extui %75 : vector<64x64xi1> to vector<64x64xi32>
    %77 = arith.sitofp %76 : vector<64x64xi32> to vector<64x64xf32>
    %78 = arith.addf %69, %77 : vector<64x64xf32>
    %cst_14 = arith.constant -1.000000e+30 : f32
    %79 = vector.broadcast %cst_14 : f32 to vector<64x64xf32>
    %80 = arith.select %75, %79, %71 : vector<64x64xi1>, vector<64x64xf32>
    %cst_15 = arith.constant dense<0xFF800000> : vector<64xf32>
    %81 = vector.multi_reduction <maximumf>, %80, %cst_15 [1] : vector<64x64xf32> to vector<64xf32>
    %82 = vector.shape_cast %81 : vector<64xf32> to vector<64x1xf32>
    %83 = vector.broadcast %82 : vector<64x1xf32> to vector<64x64xf32>
    %84 = arith.cmpf oeq, %80, %83 : vector<64x64xf32>
    %85 = arith.extui %84 : vector<64x64xi1> to vector<64x64xi32>
    %86 = arith.sitofp %85 : vector<64x64xi32> to vector<64x64xf32>
    %87 = arith.addf %78, %86 : vector<64x64xf32>
    %cst_16 = arith.constant -1.000000e+30 : f32
    %88 = vector.broadcast %cst_16 : f32 to vector<64x64xf32>
    %89 = arith.select %84, %88, %80 : vector<64x64xi1>, vector<64x64xf32>
    %cst_17 = arith.constant dense<0xFF800000> : vector<64xf32>
    %90 = vector.multi_reduction <maximumf>, %89, %cst_17 [1] : vector<64x64xf32> to vector<64xf32>
    %91 = vector.shape_cast %90 : vector<64xf32> to vector<64x1xf32>
    %92 = vector.broadcast %91 : vector<64x1xf32> to vector<64x64xf32>
    %93 = arith.cmpf oeq, %89, %92 : vector<64x64xf32>
    %94 = arith.extui %93 : vector<64x64xi1> to vector<64x64xi32>
    %95 = arith.sitofp %94 : vector<64x64xi32> to vector<64x64xf32>
    %96 = arith.addf %87, %95 : vector<64x64xf32>
    %cst_18 = arith.constant 9.99999993E-9 : f32
    %97 = vector.broadcast %cst_18 : f32 to vector<64x64xf32>
    %98 = arith.addf %25, %97 : vector<64x64xf32>
    %99 = tpu.reciprocal %98 {approx = true} : vector<64x64xf32> -> vector<64x64xf32>
    %100 = arith.mulf %98, %99 : vector<64x64xf32>
    %cst_19 = arith.constant 2.000000e+00 : f32
    %101 = vector.broadcast %cst_19 : f32 to vector<64x64xf32>
    %102 = arith.subf %101, %100 : vector<64x64xf32>
    %103 = arith.mulf %99, %102 : vector<64x64xf32>
    %104 = arith.mulf %96, %103 : vector<64x64xf32>
    %cst_20 = arith.constant dense<0.000000e+00> : vector<64xf32>
    %105 = vector.multi_reduction <add>, %104, %cst_20 [1] : vector<64x64xf32> to vector<64xf32>
    %106 = vector.shape_cast %105 : vector<64xf32> to vector<64x1xf32>
    %107 = tpu.reciprocal %106 {approx = true} : vector<64x1xf32> -> vector<64x1xf32>
    %108 = arith.mulf %106, %107 : vector<64x1xf32>
    %cst_21 = arith.constant 2.000000e+00 : f32
    %109 = vector.broadcast %cst_21 : f32 to vector<64x1xf32>
    %110 = arith.subf %109, %108 : vector<64x1xf32>
    %111 = arith.mulf %107, %110 : vector<64x1xf32>
    %112 = vector.broadcast %111 : vector<64x1xf32> to vector<64x64xf32>
    %113 = arith.mulf %104, %112 : vector<64x64xf32>
    %114 = arith.index_cast %c0_i32 : i32 to index
    %c0_22 = arith.constant 0 : index
    %c0_23 = arith.constant 0 : index
    %115 = vector.load %arg5[%114, %c0_22, %c0_23] : memref<1x64x16xf32, #tpu.memory_space<vmem>>, vector<1x64x16xf32>
    %116 = vector.shape_cast %115 : vector<1x64x16xf32> to vector<64x16xf32>
    %cst_24 = arith.constant dense<0.000000e+00> : vector<64x16xf32>
    %117 = tpu.matmul %113, %116, %cst_24 {dimension_numbers = #tpu.dot_dimension_numbers<[1], [0], [0], [1], [0, 0, 1, 1], [], []>} : vector<64x64xf32>, vector<64x16xf32>, vector<64x16xf32> -> vector<64x16xf32>
    %118 = arith.index_cast %c0_i32 : i32 to index
    %c0_25 = arith.constant 0 : index
    %c0_26 = arith.constant 0 : index
    %119 = vector.load %arg4[%118, %c0_25, %c0_26] : memref<1x64x16xf32, #tpu.memory_space<vmem>>, vector<1x64x16xf32>
    %120 = vector.shape_cast %119 : vector<1x64x16xf32> to vector<64x16xf32>
    %c0_27 = arith.constant 0 : index
    %c0_28 = arith.constant 0 : index
    %121 = vector.load %arg6[%c0_27, %c0_28] : memref<16x16xf32, #tpu.memory_space<vmem>>, vector<16x16xf32>
    %cst_29 = arith.constant dense<0.000000e+00> : vector<64x16xf32>
    %122 = tpu.matmul %120, %121, %cst_29 {dimension_numbers = #tpu.dot_dimension_numbers<[1], [0], [0], [1], [0, 0, 1, 1], [], []>} : vector<64x16xf32>, vector<16x16xf32>, vector<64x16xf32> -> vector<64x16xf32>
    %123 = arith.addf %122, %117 : vector<64x16xf32>
    %c0_30 = arith.constant 0 : index
    %c0_31 = arith.constant 0 : index
    %124 = vector.load %arg7[%c0_30, %c0_31] : memref<1x16xf32, #tpu.memory_space<vmem>>, vector<1x16xf32>
    %125 = vector.broadcast %124 : vector<1x16xf32> to vector<64x16xf32>
    %126 = arith.addf %123, %125 : vector<64x16xf32>
    %127 = arith.index_cast %c0_i32 : i32 to index
    %c0_32 = arith.constant 0 : index
    %c0_33 = arith.constant 0 : index
    %128 = vector.load %arg8[%127, %c0_32, %c0_33] : memref<1x64x16xf32, #tpu.memory_space<vmem>>, vector<1x64x16xf32>
    %129 = vector.shape_cast %128 : vector<1x64x16xf32> to vector<64x16xf32>
    %130 = vector.shape_cast %126 : vector<64x16xf32> to vector<1x64x16xf32>
    tpu.vector_store %arg8[%127, %c0_32, %c0_33], %130 {strides = array<i32>} : memref<1x64x16xf32, #tpu.memory_space<vmem>>, vector<1x64x16xf32>,
    %c1_i32 = arith.constant 1 : i32
    return
  }
  func.func @transform_0(%arg0: i32, %arg1: i32) -> (i32, i32, i32) {
    %c0_i32 = arith.constant 0 : i32
    %c0_i32_0 = arith.constant 0 : i32
    %c0_i32_1 = arith.constant 0 : i32
    return %arg0, %c0_i32, %c0_i32_0 : i32, i32, i32
  }
  func.func @transform_1(%arg0: i32, %arg1: i32) -> (i32, i32, i32) {
    %c0_i32 = arith.constant 0 : i32
    %c0_i32_0 = arith.constant 0 : i32
    return %arg0, %arg1, %c0_i32 : i32, i32, i32
  }
  func.func @transform_2(%arg0: i32, %arg1: i32) -> (i32, i32, i32) {
    %c0_i32 = arith.constant 0 : i32
    %c0_i32_0 = arith.constant 0 : i32
    return %arg0, %arg1, %c0_i32 : i32, i32, i32
  }
  func.func @transform_3(%arg0: i32, %arg1: i32) -> (i32, i32, i32) {
    %c0_i32 = arith.constant 0 : i32
    %c0_i32_0 = arith.constant 0 : i32
    %c0_i32_1 = arith.constant 0 : i32
    return %arg0, %c0_i32, %c0_i32_0 : i32, i32, i32
  }
  func.func @transform_4(%arg0: i32, %arg1: i32) -> (i32, i32) {
    %c0_i32 = arith.constant 0 : i32
    %c0_i32_0 = arith.constant 0 : i32
    %c0_i32_1 = arith.constant 0 : i32
    return %c0_i32, %c0_i32_0 : i32, i32
  }
  func.func @transform_5(%arg0: i32, %arg1: i32) -> (i32, i32) {
    %c0_i32 = arith.constant 0 : i32
    %c0_i32_0 = arith.constant 0 : i32
    %c0_i32_1 = arith.constant 0 : i32
    return %c0_i32, %c0_i32_0 : i32, i32
  }
  func.func @transform_6(%arg0: i32, %arg1: i32) -> (i32, i32, i32) {
    %c0_i32 = arith.constant 0 : i32
    %c0_i32_0 = arith.constant 0 : i32
    return %arg0, %arg1, %c0_i32 : i32, i32, i32
  }
}

</mosaic_0001>

<bundles_post_ra>
// kernel: tpu_custom_call.1
= control target key start
LH: loop header
LB: loop body
LE: loop exit
PB: predicated region body
PF: predicated region fallthrough
CT: control target
= control target key end

     0   :  { %s1936_s21 = smov 0   ;;  %s1938_s22 = smov 0   ;;  %s2430_s0 = inlined_call_operand.vmem [shape: f32[2,3,64], index: 0, kind: input, shape index: {}]   ;;  %s2431_s1 = inlined_call_operand.vmem [shape: f32[2,64,3], index: 1, kind: input, shape index: {}]   ;;  %s2432_s2 = inlined_call_operand.vmem [shape: f32[2,64,16], index: 2, kind: input, shape index: {}]   ;;  %s2433_s3 = inlined_call_operand.vmem [shape: f32[2,64,16], index: 3, kind: input, shape index: {}]   ;;  %s2434_s4 = inlined_call_operand.vmem [shape: f32[16,16], index: 4, kind: input, shape index: {}]   ;;  %s2435_s5 = inlined_call_operand.vmem [shape: f32[1,16], index: 5, kind: input, shape index: {}]   ;;  %s2436_s6 = inlined_call_operand.vmem [shape: f32[2,64,16], index: 6, kind: output, shape index: {}]  }
   0x1   :  { %s1940_s23 = smov 0  }
   0x2 LB: > { %s28_s24 = sadd.s32 1, %s1891_s22  ;;  %p1603_p0 = scmp.ge.s32.totalorder %s1895_s23, 1  ;;  %s1895_s23 = sphi %s1940_s23, %s16_s23   ;;  %s1891_s22 = sphi %s1938_s22, %s2438_s22   ;;  %s1887_s21 = sphi %s1936_s21, %s2437_s21  }
   0x3   : > { %p30_p1 = scmp.ge.s32.totalorder %s28_s24, 2  ;;  %p269_p2 = scmp.lt.s32.totalorder %s1895_s23, 3 }
   0x5   : > { %s2440_s24 = smov (%p30_p1, %s28_s24), 0  ;;  %p270_p3 = pnand %p1603_p0, %p269_p2 }
   0x6   : > { %p325_p4 = scmp.lt.s32.totalorder (!%p270_p3), %s1887_s21, 1  ;;  %v1897_v0 = vmov (!%p270_p3), 1   ;;  %v1898_v1 = vmov (!%p270_p3), 0   ;;  %v1899_v5 = vmov (!%p270_p3), 2   ;;  %v413_v11 = vlaneseq (!%p270_p3) }
   0x7   : > { %273 = sbr.rel (%p270_p3) target bundleno = 1766 (0x6e6), region = 44  ;;  %1826 = vset.pattern.permute.xlu0 (!%p270_p3), %v1897_v0  ;;  %1828 = vset.pattern.permute.xlu1 (!%p270_p3), %v1898_v1  ;;  %vm561_vm0 = vcmask (!%p270_p3), 523264  }
   0x8   : > { %v414_v12 = vshrl.u32 (!%p270_p3), %v413_v11, 7 }
   0xa   : > { %v467_v13 = vsub.s32 (!%p270_p3), 1, %v414_v12  ;;  %v415_v14 = vsub.s32 (!%p270_p3), 0, %v414_v12  ;;  %v527_v19 = vsub.s32 (!%p270_p3), 2, %v414_v12 }
   0xe   : > { %s2442_s21 = smov (!%p325_p4, %s1887_s21), 1 }
   0xf   : > { %s1957_s25 = sshll.u32 %s2442_s21, 6  ;;  %s1604_s29 = sshll.u32 %s2442_s21, 2 }
  0x10   : > { %s1963_s28 = scalar_lea.vmem %s2431_s1, %s1957_s25  ;;  %s328_s8 = scalar_lea.vmem %s2430_s0, %s1604_s29 }
  0x11   : > { %v366_v2 = vld [vmem:[%s1963_s28 + $0x8] sm:$0xff]  ;;  %v365_v3 = vld [vmem:[%s1963_s28] sm:$0xff]  ;;  %v368_v4 = vld [vmem:[%s1963_s28 + $0x18] sm:$0xff]  ;;  %s2323_s11 = scalar_lea.vmem %s2433_s3, %s1957_s25  ;;  %s2358_s18 = scalar_lea.vmem %s2432_s2, %s1957_s25 }
  0x12   : > { %380 = vperm.xlu1 %1828, %v366_v2   ;;  %434 = vperm.xlu0 %1826, %v365_v3   ;;  %v370_v6 = vld [vmem:[%s1963_s28 + $0x28] sm:$0xff]  ;;  %v367_v7 = vld [vmem:[%s1963_s28 + $0x10] sm:$0xff]  ;;  %v372_v8 = vld [vmem:[%s1963_s28 + $0x38] sm:$0xff]  ;;  %s362_s27 = scalar_lea.vmem %s2436_s6, %s1957_s25 }
  0x13   : > { %v369_v9 = vld [vmem:[%s1963_s28 + $0x20] sm:$0xff]  ;;  %v371_v10 = vld [vmem:[%s1963_s28 + $0x30] sm:$0xff] }
  0x14   : > { %v364_v15 = vld [vmem:[%s328_s8] sm:$0x7] }
  0x15   : > { %v1977_v18 = vrot.slane %v364_v15, %v467_v13  ;;  %v1980_v21 = vrot.slane %v364_v15, %v415_v14  ;;  %v1983_v25 = vrot.slane %v364_v15, %v527_v19 }
  0x16   : > { %1829 = vset.pattern.permute.xlu1 %v1897_v0  ;;  %1827 = vset.pattern.permute.xlu0 %v1898_v1 }
  0x17   : > { %438 = vperm.xlu1 %1829, %v366_v2   ;;  %375 = vperm.xlu0 %1827, %v365_v3  }
  0x1b   : > { %1830 = vset.pattern.permute.xlu1 %v1899_v5  ;;  %390 = vperm.xlu0 %1827, %v368_v4  }
  0x1c   : > { %494 = vperm.xlu1 %1830, %v365_v3  }
  0x1f   : > { %400 = vperm.xlu0 %1827, %v370_v6  }
  0x20   : > { %1831 = vset.pattern.permute.xlu1 %v1898_v1 }
  0x21   : > { %385 = vperm.xlu1 %1831, %v367_v7  }
  0x23   : > { %410 = vperm.xlu0 %1827, %v372_v8  }
  0x25   : > { %1832 = vset.pattern.permute.xlu1 %v1897_v0 }
  0x26   : > { %442 = vperm.xlu1 %1832, %v367_v7  }
  0x27   : > { %1839 = vset.pattern.permute.xlu0 %v1899_v5 }
  0x28   : > { %498 = vperm.xlu0 %1839, %v366_v2  }
  0x2a   : > { %446 = vperm.xlu1 %1832, %v368_v4  }
  0x2c   : > { %506 = vperm.xlu0 %1839, %v368_v4  }
  0x2e   : > { %1833 = vset.pattern.permute.xlu1 %v1899_v5 }
  0x2f   : > { %502 = vperm.xlu1 %1833, %v367_v7  }
  0x30   : > { %514 = vperm.xlu0 %1839, %v370_v6  }
  0x33   : > { %1834 = vset.pattern.permute.xlu1 %v1898_v1 }
  0x34   : > { %395 = vperm.xlu1 %1834, %v369_v9   ;;  %522 = vperm.xlu0 %1839, %v372_v8  }
  0x38   : > { %1835 = vset.pattern.permute.xlu1 %v1897_v0 }
  0x39   : > { %450 = vperm.xlu1 %1835, %v369_v9  }
  0x3d   : > { %454 = vperm.xlu1 %1835, %v370_v6  }
  0x41   : > { %1836 = vset.pattern.permute.xlu1 %v1899_v5 }
  0x42   : > { %510 = vperm.xlu1 %1836, %v369_v9  }
  0x46   : > { %1837 = vset.pattern.permute.xlu1 %v1898_v1 }
  0x47   : > { %405 = vperm.xlu1 %1837, %v371_v10  }
  0x4b   : > { %1838 = vset.pattern.permute.xlu1 %v1897_v0 }
  0x4c   : > { %458 = vperm.xlu1 %1838, %v371_v10  }
  0x50   : > { %462 = vperm.xlu1 %1838, %v372_v8  }
  0x54   : > { %1840 = vset.pattern.permute.xlu1 %v1899_v5 }
  0x55   : > { %518 = vperm.xlu1 %1840, %v371_v10  }
  0x91   : > { %v381_v16 = vpop.permute.xlu1 %380  ;;  %v435_v17 = vpop.permute.xlu0 %434 }
  0x92   : > { %v469_v20 = vsub.f32 %v435_v17, %v1977_v18  ;;  %v418_v39 = vsub.f32 %v381_v16, %v1980_v21 }
  0x94   : > { %v477_v26 = vmul.f32 %v469_v20, %v469_v20  ;;  %v426_v45 = vmul.f32 %v418_v39, %v418_v39 }
  0x96   : > { %v439_v22 = vpop.permute.xlu1 %438  ;;  %v376_v23 = vpop.permute.xlu0 %375 }
  0x97   : > { %v417_v24 = vsub.f32 %v376_v23, %v1980_v21  ;;  %v470_v36 = vsub.f32 %v439_v22, %v1977_v18 }
  0x99   : > { %v425_v27 = vmul.f32 %v417_v24, %v417_v24  ;;  %v478_v42 = vmul.f32 %v470_v36, %v470_v36 }
  0x9a   : > { %v391_v28 = vpop.permute.xlu0 %390 }
  0x9b   : > { %v495_v29 = vpop.permute.xlu1 %494  ;;  %v485_v30 = vadd.f32 %v477_v26, %v425_v27  ;;  %v420_v43 = vsub.f32 %v391_v28, %v1980_v21  ;;  %v486_v49 = vadd.f32 %v478_v42, %v426_v45 }
  0x9c   : > { %v529_v31 = vsub.f32 %v495_v29, %v1983_v25 }
  0x9d   : > { %v428_v50 = vmul.f32 %v420_v43, %v420_v43 }
  0x9e   : > { %v537_v32 = vmul.f32 %v529_v31, %v529_v31  ;;  %v401_v33 = vpop.permute.xlu0 %400 }
  0x9f   : > { %v422_v13 = vsub.f32 %v401_v33, %v1980_v21 }
  0xa0   : > { %v1986_v34 = vadd.f32 %v537_v32, %v485_v30  ;;  %v386_v35 = vpop.permute.xlu1 %385 }
  0xa1   : > { %v419_v53 = vsub.f32 %v386_v35, %v1980_v21  ;;  %v430_v20 = vmul.f32 %v422_v13, %v422_v13 }
  0xa2   : > { %v1989_v37 = vpop.permute.xlu0 %410  ;;  %v1992_v38 = vsub.f32 0.0, %v1986_v34 }
  0xa3   : > { %v427_v63 = vmul.f32 %v419_v53, %v419_v53 }
  0xa4   : > { %v562_v40 = vsel %vm561_vm0, %v1992_v38, -inf }
  0xa5   : > { %v443_v41 = vpop.permute.xlu1 %442  ;;  %563 = vmax.xlane.f32.xlu1 %v562_v40 }
  0xa6   : > { %v471_v47 = vsub.f32 %v443_v41, %v1977_v18 }
  0xa7   : > { %v499_v44 = vpop.permute.xlu0 %498 }
  0xa8   : > { %v530_v46 = vsub.f32 %v499_v44, %v1983_v25  ;;  %v479_v58 = vmul.f32 %v471_v47, %v471_v47  ;;  %v424_v44 = vsub.f32 %v1989_v37, %v1980_v21 }
  0xa9   : > { %v447_v48 = vpop.permute.xlu1 %446 }
  0xaa   : > { %v538_v51 = vmul.f32 %v530_v46, %v530_v46  ;;  %v472_v52 = vsub.f32 %v447_v48, %v1977_v18  ;;  %v487_v3 = vadd.f32 %v479_v58, %v427_v63 }
  0xab   : > { %v507_v54 = vpop.permute.xlu0 %506 }
  0xac   : > { %v2002_v55 = vadd.f32 %v538_v51, %v486_v49  ;;  %v480_v56 = vmul.f32 %v472_v52, %v472_v52  ;;  %v532_v57 = vsub.f32 %v507_v54, %v1983_v25 }
  0xae   : > { %v488_v59 = vadd.f32 %v480_v56, %v428_v50  ;;  %v540_v60 = vmul.f32 %v532_v57, %v532_v57  ;;  %v503_v61 = vpop.permute.xlu1 %502  ;;  %v2006_v62 = vsub.f32 0.0, %v2002_v55  ;;  %v432_v50 = vmul.f32 %v424_v44, %v424_v44 }
  0xaf   : > { %v531_v0 = vsub.f32 %v503_v61, %v1983_v25  ;;  %v515_v12 = vpop.permute.xlu0 %514 }
  0xb0   : > { %v2009_v1 = vadd.f32 %v540_v60, %v488_v59  ;;  %v565_v2 = vsel %vm561_vm0, %v2006_v62, -inf  ;;  %v534_v14 = vsub.f32 %v515_v12, %v1983_v25 }
  0xb1   : > { %v539_v4 = vmul.f32 %v531_v0, %v531_v0  ;;  %566 = vmax.xlane.f32.xlu0 %v565_v2 }
  0xb2   : > { %v2014_v5 = vsub.f32 0.0, %v2009_v1  ;;  %v542_v23 = vmul.f32 %v534_v14, %v534_v14 }
  0xb3   : > { %v2016_v6 = vadd.f32 %v539_v4, %v487_v3  ;;  %v396_v7 = vpop.permute.xlu1 %395  ;;  %v523_v43 = vpop.permute.xlu0 %522 }
  0xb4   : > { %v571_v8 = vsel %vm561_vm0, %v2014_v5, -inf  ;;  %v421_v19 = vsub.f32 %v396_v7, %v1980_v21  ;;  %v536_v47 = vsub.f32 %v523_v43, %v1983_v25 }
  0xb5   : > { %572 = vmax.xlane.f32.xlu0 %v571_v8  ;;  %v2021_v9 = vsub.f32 0.0, %v2016_v6 }
  0xb6   : > { %v429_v28 = vmul.f32 %v421_v19, %v421_v19  ;;  %v544_v53 = vmul.f32 %v536_v47, %v536_v47 }
  0xb7   : > { %v568_v10 = vsel %vm561_vm0, %v2021_v9, -inf }
  0xb8   : > { %v451_v11 = vpop.permute.xlu1 %450  ;;  %569 = vmax.xlane.f32.xlu1 %v568_v10 }
  0xb9   : > { %v473_v15 = vsub.f32 %v451_v11, %v1977_v18 }
  0xbb   : > { %v481_v24 = vmul.f32 %v473_v15, %v473_v15 }
  0xbc   : > { %v455_v16 = vpop.permute.xlu1 %454 }
  0xbd   : > { %v474_v17 = vsub.f32 %v455_v16, %v1977_v18  ;;  %v489_v31 = vadd.f32 %v481_v24, %v429_v28 }
  0xbf   : > { %v482_v22 = vmul.f32 %v474_v17, %v474_v17 }
  0xc1   : > { %v490_v26 = vadd.f32 %v482_v22, %v430_v20  ;;  %v511_v27 = vpop.permute.xlu1 %510 }
  0xc2   : > { %v533_v29 = vsub.f32 %v511_v27, %v1983_v25 }
  0xc3   : > { %v2031_v30 = vadd.f32 %v542_v23, %v490_v26 }
  0xc4   : > { %v541_v32 = vmul.f32 %v533_v29, %v533_v29 }
  0xc5   : > { %v2034_v33 = vsub.f32 0.0, %v2031_v30 }
  0xc6   : > { %v2036_v35 = vadd.f32 %v541_v32, %v489_v31  ;;  %v406_v36 = vpop.permute.xlu1 %405 }
  0xc7   : > { %v577_v39 = vsel %vm561_vm0, %v2034_v33, -inf  ;;  %v423_v49 = vsub.f32 %v406_v36, %v1980_v21  ;;  %v1900_v36 = vmov 0.0  }
  0xc8   : > { %578 = vmax.xlane.f32.xlu0 %v577_v39  ;;  %v2041_v40 = vsub.f32 0.0, %v2036_v35 }
  0xc9   : > { %v431_v57 = vmul.f32 %v423_v49, %v423_v49 }
  0xca   : > { %v574_v41 = vsel %vm561_vm0, %v2041_v40, -inf }
  0xcb   : > { %v459_v42 = vpop.permute.xlu1 %458  ;;  %575 = vmax.xlane.f32.xlu1 %v574_v41 }
  0xcc   : > { %v475_v45 = vsub.f32 %v459_v42, %v1977_v18 }
  0xce   : > { %v483_v52 = vmul.f32 %v475_v45, %v475_v45 }
  0xcf   : > { %v463_v46 = vpop.permute.xlu1 %462 }
  0xd0   : > { %v476_v48 = vsub.f32 %v463_v46, %v1977_v18  ;;  %v491_v37 = vadd.f32 %v483_v52, %v431_v57 }
  0xd2   : > { %v484_v51 = vmul.f32 %v476_v48, %v476_v48 }
  0xd4   : > { %v492_v54 = vadd.f32 %v484_v51, %v432_v50  ;;  %v519_v56 = vpop.permute.xlu1 %518 }
  0xd5   : > { %v535_v58 = vsub.f32 %v519_v56, %v1983_v25 }
  0xd6   : > { %v2052_v59 = vadd.f32 %v544_v53, %v492_v54 }
  0xd7   : > { %v543_v60 = vmul.f32 %v535_v58, %v535_v58 }
  0xd8   : > { %v2055_v61 = vsub.f32 0.0, %v2052_v59 }
  0xd9   : > { %v2057_v63 = vadd.f32 %v543_v60, %v491_v37 }
  0xda   : > { %v583_v18 = vsel %vm561_vm0, %v2055_v61, -inf }
  0xdb   : > { %584 = vmax.xlane.f32.xlu0 %v583_v18  ;;  %v2062_v21 = vsub.f32 0.0, %v2057_v63 }
  0xdd   : > { %v580_v0 = vsel %vm561_vm0, %v2062_v21, -inf }
  0xde   : > { %581 = vmax.xlane.f32.xlu1 %v580_v0 }
 0x132   : > { %v564_v25 = vpop.xlane.xlu1 %563 }
 0x133   : > { %vm586_vm1 = vcmp.eq.f32.partialorder %v1992_v38, %v564_v25 }
 0x134   : > { %v610_v2 = vsel %vm586_vm1, -1e+30, %v1992_v38  ;;  %v1613_v39 = vsel %vm586_vm1, 1.0, %v1900_v36 }
 0x135   : > { %v618_v3 = vsel %vm561_vm0, %v610_v2, -inf }
 0x136   : > { %619 = vmax.xlane.f32.xlu1 %v618_v3 }
 0x13e   : > { %v567_v4 = vpop.xlane.xlu0 %566 }
 0x13f   : > { %vm587_vm2 = vcmp.eq.f32.partialorder %v2006_v62, %v567_v4 }
 0x140   : > { %v611_v7 = vsel %vm587_vm2, -1e+30, %v2006_v62  ;;  %v1614_v46 = vsel %vm587_vm2, 1.0, %v1900_v36 }
 0x141   : > { %v621_v8 = vsel %vm561_vm0, %v611_v7, -inf }
 0x142   : > { %622 = vmax.xlane.f32.xlu0 %v621_v8  ;;  %v573_v10 = vpop.xlane.xlu0 %572 }
 0x143   : > { %vm589_vm3 = vcmp.eq.f32.partialorder %v2014_v5, %v573_v10 }
 0x144   : > { %v613_v11 = vsel %vm589_vm3, -1e+30, %v2014_v5  ;;  %v1616_v51 = vsel %vm589_vm3, 1.0, %v1900_v36 }
 0x145   : > { %v570_v12 = vpop.xlane.xlu1 %569  ;;  %v627_v13 = vsel %vm561_vm0, %v613_v11, -inf }
 0x146   : > { %vm588_vm4 = vcmp.eq.f32.partialorder %v2021_v9, %v570_v12  ;;  %628 = vmax.xlane.f32.xlu0 %v627_v13 }
 0x147   : > { %v612_v14 = vsel %vm588_vm4, -1e+30, %v2021_v9  ;;  %v1615_v57 = vsel %vm588_vm4, 1.0, %v1900_v36 }
 0x148   : > { %v624_v15 = vsel %vm561_vm0, %v612_v14, -inf }
 0x149   : > { %625 = vmax.xlane.f32.xlu1 %v624_v15 }
 0x155   : > { %v579_v16 = vpop.xlane.xlu0 %578 }
 0x156   : > { %vm591_vm5 = vcmp.eq.f32.partialorder %v2034_v33, %v579_v16 }
 0x157   : > { %v615_v17 = vsel %vm591_vm5, -1e+30, %v2034_v33  ;;  %v1618_v0 = vsel %vm591_vm5, 1.0, %v1900_v36 }
 0x158   : > { %v576_v19 = vpop.xlane.xlu1 %575  ;;  %v633_v20 = vsel %vm561_vm0, %v615_v17, -inf }
 0x159   : > { %vm590_vm6 = vcmp.eq.f32.partialorder %v2041_v40, %v576_v19  ;;  %634 = vmax.xlane.f32.xlu0 %v633_v20 }
 0x15a   : > { %v614_v22 = vsel %vm590_vm6, -1e+30, %v2041_v40 }
 0x15b   : > { %v630_v23 = vsel %vm561_vm0, %v614_v22, -inf }
 0x15c   : > { %631 = vmax.xlane.f32.xlu1 %v630_v23 }
 0x168   : > { %v585_v24 = vpop.xlane.xlu0 %584 }
 0x169   : > { %vm593_vm7 = vcmp.eq.f32.partialorder %v2055_v61, %v585_v24 }
 0x16a   : > { %v617_v26 = vsel %vm593_vm7, -1e+30, %v2055_v61  ;;  %v1620_v13 = vsel %vm593_vm7, 1.0, %v1900_v36 }
 0x16b   : > { %v2100_v27 = vpop.xlane.xlu1 %581  ;;  %v639_v28 = vsel %vm561_vm0, %v617_v26, -inf }
 0x16c   : > { %vm592_vm8 = vcmp.eq.f32.partialorder %v2062_v21, %v2100_v27  ;;  %640 = vmax.xlane.f32.xlu0 %v639_v28 }
 0x16d   : > { %v2109_v29 = vsel %vm592_vm8, -1e+30, %v2062_v21  ;;  %v1619_v19 = vsel %vm592_vm8, 1.0, %v1900_v36 }
 0x16e   : > { %v636_v31 = vsel %vm561_vm0, %v2109_v29, -inf }
 0x16f   : > { %637 = vmax.xlane.f32.xlu1 %v636_v31 }
 0x1c3   : > { %v620_v32 = vpop.xlane.xlu1 %619 }
 0x1c4   : > { %vm642_vm9 = vcmp.eq.f32.partialorder %v610_v2, %v620_v32 }
 0x1c5   : > { %v1621_v41 = vsel %vm642_vm9, 1.0, %v1900_v36  ;;  %v2117_v42 = vsel %vm642_vm9, -1e+30, %v610_v2 }
 0x1c6   : > { %v2119_v43 = vadd.f32 %v1621_v41, %v1613_v39  ;;  %v682_v44 = vsel %vm561_vm0, %v2117_v42, -inf }
 0x1c7   : > { %683 = vmax.xlane.f32.xlu1 %v682_v44 }
 0x1cf   : > { %v623_v45 = vpop.xlane.xlu0 %622 }
 0x1d0   : > { %vm643_vm10 = vcmp.eq.f32.partialorder %v611_v7, %v623_v45 }
 0x1d1   : > { %v1622_v47 = vsel %vm643_vm10, 1.0, %v1900_v36  ;;  %v675_v38 = vsel %vm643_vm10, -1e+30, %v611_v7  ;;  %v1617_v7 = vsel %vm590_vm6, 1.0, %v1900_v36 }
 0x1d2   : > { %v667_v48 = vadd.f32 %v1622_v47, %v1614_v46  ;;  %v685_v49 = vsel %vm561_vm0, %v675_v38, -inf }
 0x1d3   : > { %686 = vmax.xlane.f32.xlu0 %v685_v49  ;;  %v629_v50 = vpop.xlane.xlu0 %628 }
 0x1d4   : > { %vm645_vm11 = vcmp.eq.f32.partialorder %v613_v11, %v629_v50 }
 0x1d5   : > { %v1624_v52 = vsel %vm645_vm11, 1.0, %v1900_v36  ;;  %v677_v53 = vsel %vm645_vm11, -1e+30, %v613_v11 }
 0x1d6   : > { %v669_v54 = vadd.f32 %v1624_v52, %v1616_v51  ;;  %v626_v56 = vpop.xlane.xlu1 %625  ;;  %v691_v62 = vsel %vm561_vm0, %v677_v53, -inf }
 0x1d7   : > { %vm644_vm12 = vcmp.eq.f32.partialorder %v612_v14, %v626_v56  ;;  %692 = vmax.xlane.f32.xlu0 %v691_v62 }
 0x1d8   : > { %v1623_v58 = vsel %vm644_vm12, 1.0, %v1900_v36  ;;  %v676_v37 = vsel %vm644_vm12, -1e+30, %v612_v14 }
 0x1d9   : > { %v668_v60 = vadd.f32 %v1623_v58, %v1615_v57  ;;  %v688_v5 = vsel %vm561_vm0, %v676_v37, -inf }
 0x1da   : > { %689 = vmax.xlane.f32.xlu1 %v688_v5 }
 0x1e6   : > { %v635_v18 = vpop.xlane.xlu0 %634 }
 0x1e7   : > { %vm647_vm13 = vcmp.eq.f32.partialorder %v615_v17, %v635_v18 }
 0x1e8   : > { %v1626_v25 = vsel %vm647_vm13, 1.0, %v1900_v36  ;;  %v679_v2 = vsel %vm647_vm13, -1e+30, %v615_v17 }
 0x1e9   : > { %v671_v3 = vadd.f32 %v1626_v25, %v1618_v0  ;;  %v632_v4 = vpop.xlane.xlu1 %631  ;;  %v697_v9 = vsel %vm561_vm0, %v679_v2, -inf }
 0x1ea   : > { %vm646_vm14 = vcmp.eq.f32.partialorder %v614_v22, %v632_v4  ;;  %698 = vmax.xlane.f32.xlu0 %v697_v9 }
 0x1eb   : > { %v1625_v8 = vsel %vm646_vm14, 1.0, %v1900_v36  ;;  %v678_v10 = vsel %vm646_vm14, -1e+30, %v614_v22 }
 0x1ec   : > { %v670_v11 = vadd.f32 %v1625_v8, %v1617_v7  ;;  %v694_v33 = vsel %vm561_vm0, %v678_v10, -inf }
 0x1ed   : > { %695 = vmax.xlane.f32.xlu1 %v694_v33 }
 0x1f9   : > { %v641_v12 = vpop.xlane.xlu0 %640 }
 0x1fa   : > { %vm649_vm15 = vcmp.eq.f32.partialorder %v617_v26, %v641_v12 }
 0x1fb   : > { %v1628_v14 = vsel %vm649_vm15, 1.0, %v1900_v36  ;;  %v681_v15 = vsel %vm649_vm15, -1e+30, %v617_v26 }
 0x1fc   : > { %v673_v16 = vadd.f32 %v1628_v14, %v1620_v13  ;;  %v638_v17 = vpop.xlane.xlu1 %637  ;;  %v703_v40 = vsel %vm561_vm0, %v681_v15, -inf }
 0x1fd   : > { %vm648_vm1 = vcmp.eq.f32.partialorder %v2109_v29, %v638_v17  ;;  %704 = vmax.xlane.f32.xlu0 %v703_v40 }
 0x1fe   : > { %v1627_v20 = vsel %vm648_vm1, 1.0, %v1900_v36  ;;  %v680_v61 = vsel %vm648_vm1, -1e+30, %v2109_v29 }
 0x1ff   : > { %v672_v22 = vadd.f32 %v1627_v20, %v1619_v19  ;;  %v700_v23 = vsel %vm561_vm0, %v680_v61, -inf }
 0x200   : > { %701 = vmax.xlane.f32.xlu1 %v700_v23 }
 0x254   : > { %v684_v24 = vpop.xlane.xlu1 %683 }
 0x255   : > { %vm706_vm2 = vcmp.eq.f32.partialorder %v2117_v42, %v684_v24 }
 0x256   : > { %v1629_v26 = vsel %vm706_vm2, 1.0, %v1900_v36  ;;  %v738_v28 = vsel %vm706_vm2, -1e+30, %v2117_v42 }
 0x257   : > { %v730_v31 = vadd.f32 %v1629_v26, %v2119_v43  ;;  %v746_v21 = vsel %vm561_vm0, %v738_v28, -inf }
 0x258   : > { %747 = vmax.xlane.f32.xlu1 %v746_v21 }
 0x260   : > { %v687_v27 = vpop.xlane.xlu0 %686 }
 0x261   : > { %vm707_vm3 = vcmp.eq.f32.partialorder %v675_v38, %v687_v27 }
 0x262   : > { %v1630_v29 = vsel %vm707_vm3, 1.0, %v1900_v36  ;;  %v739_v32 = vsel %vm707_vm3, -1e+30, %v675_v38 }
 0x263   : > { %v731_v39 = vadd.f32 %v1630_v29, %v667_v48  ;;  %v749_v41 = vsel %vm561_vm0, %v739_v32, -inf }
 0x264   : > { %750 = vmax.xlane.f32.xlu0 %v749_v41  ;;  %v693_v44 = vpop.xlane.xlu0 %692 }
 0x265   : > { %vm709_vm4 = vcmp.eq.f32.partialorder %v677_v53, %v693_v44 }
 0x266   : > { %v1632_v45 = vsel %vm709_vm4, 1.0, %v1900_v36  ;;  %v741_v46 = vsel %vm709_vm4, -1e+30, %v677_v53 }
 0x267   : > { %v733_v42 = vadd.f32 %v1632_v45, %v669_v54  ;;  %v690_v47 = vpop.xlane.xlu1 %689  ;;  %v755_v43 = vsel %vm561_vm0, %v741_v46, -inf }
 0x268   : > { %vm708_vm5 = vcmp.eq.f32.partialorder %v676_v37, %v690_v47  ;;  %756 = vmax.xlane.f32.xlu0 %v755_v43 }
 0x269   : > { %v1631_v49 = vsel %vm708_vm5, 1.0, %v1900_v36  ;;  %v740_v50 = vsel %vm708_vm5, -1e+30, %v676_v37 }
 0x26a   : > { %v732_v51 = vadd.f32 %v1631_v49, %v668_v60  ;;  %v752_v38 = vsel %vm561_vm0, %v740_v50, -inf }
 0x26b   : > { %753 = vmax.xlane.f32.xlu1 %v752_v38 }
 0x277   : > { %v699_v48 = vpop.xlane.xlu0 %698 }
 0x278   : > { %vm711_vm6 = vcmp.eq.f32.partialorder %v679_v2, %v699_v48 }
 0x279   : > { %v1634_v52 = vsel %vm711_vm6, 1.0, %v1900_v36  ;;  %v743_v56 = vsel %vm711_vm6, -1e+30, %v679_v2 }
 0x27a   : > { %v735_v62 = vadd.f32 %v1634_v52, %v671_v3  ;;  %v696_v53 = vpop.xlane.xlu1 %695  ;;  %v761_v54 = vsel %vm561_vm0, %v743_v56, -inf }
 0x27b   : > { %vm710_vm7 = vcmp.eq.f32.partialorder %v678_v10, %v696_v53  ;;  %762 = vmax.xlane.f32.xlu0 %v761_v54 }
 0x27c   : > { %v1633_v57 = vsel %vm710_vm7, 1.0, %v1900_v36  ;;  %v742_v58 = vsel %vm710_vm7, -1e+30, %v678_v10 }
 0x27d   : > { %v734_v5 = vadd.f32 %v1633_v57, %v670_v11  ;;  %v758_v37 = vsel %vm561_vm0, %v742_v58, -inf }
 0x27e   : > { %759 = vmax.xlane.f32.xlu1 %v758_v37 }
 0x28a   : > { %v705_v60 = vpop.xlane.xlu0 %704 }
 0x28b   : > { %vm713_vm8 = vcmp.eq.f32.partialorder %v681_v15, %v705_v60 }
 0x28c   : > { %v1636_v18 = vsel %vm713_vm8, 1.0, %v1900_v36  ;;  %v745_v0 = vsel %vm713_vm8, -1e+30, %v681_v15 }
 0x28d   : > { %v737_v25 = vadd.f32 %v1636_v18, %v673_v16  ;;  %v702_v2 = vpop.xlane.xlu1 %701  ;;  %v767_v3 = vsel %vm561_vm0, %v745_v0, -inf }
 0x28e   : > { %vm712_vm9 = vcmp.eq.f32.partialorder %v680_v61, %v702_v2  ;;  %768 = vmax.xlane.f32.xlu0 %v767_v3 }
 0x28f   : > { %v1635_v4 = vsel %vm712_vm9, 1.0, %v1900_v36  ;;  %v744_v9 = vsel %vm712_vm9, -1e+30, %v680_v61 }
 0x290   : > { %v736_v7 = vadd.f32 %v1635_v4, %v672_v22  ;;  %v764_v8 = vsel %vm561_vm0, %v744_v9, -inf }
 0x291   : > { %765 = vmax.xlane.f32.xlu1 %v764_v8 }
 0x2e5   : > { %v748_v10 = vpop.xlane.xlu1 %747 }
 0x2e6   : > { %vm770_vm10 = vcmp.eq.f32.partialorder %v738_v28, %v748_v10 }
 0x2e7   : > { %v1637_v11 = vsel %vm770_vm10, 1.0, %v1900_v36  ;;  %v802_v33 = vsel %vm770_vm10, -1e+30, %v738_v28 }
 0x2e8   : > { %v794_v12 = vadd.f32 %v1637_v11, %v730_v31  ;;  %v810_v13 = vsel %vm561_vm0, %v802_v33, -inf }
 0x2e9   : > { %811 = vmax.xlane.f32.xlu1 %v810_v13 }
 0x2f1   : > { %v751_v14 = vpop.xlane.xlu0 %750 }
 0x2f2   : > { %vm771_vm11 = vcmp.eq.f32.partialorder %v739_v32, %v751_v14 }
 0x2f3   : > { %v1638_v15 = vsel %vm771_vm11, 1.0, %v1900_v36  ;;  %v803_v16 = vsel %vm771_vm11, -1e+30, %v739_v32 }
 0x2f4   : > { %v795_v17 = vadd.f32 %v1638_v15, %v731_v39  ;;  %v813_v40 = vsel %vm561_vm0, %v803_v16, -inf }
 0x2f5   : > { %814 = vmax.xlane.f32.xlu0 %v813_v40  ;;  %v757_v19 = vpop.xlane.xlu0 %756 }
 0x2f6   : > { %vm773_vm12 = vcmp.eq.f32.partialorder %v741_v46, %v757_v19 }
 0x2f7   : > { %v1640_v20 = vsel %vm773_vm12, 1.0, %v1900_v36  ;;  %v805_v61 = vsel %vm773_vm12, -1e+30, %v741_v46 }
 0x2f8   : > { %v797_v22 = vadd.f32 %v1640_v20, %v733_v42  ;;  %v754_v23 = vpop.xlane.xlu1 %753  ;;  %v819_v24 = vsel %vm561_vm0, %v805_v61, -inf }
 0x2f9   : > { %vm772_vm13 = vcmp.eq.f32.partialorder %v740_v50, %v754_v23  ;;  %820 = vmax.xlane.f32.xlu0 %v819_v24 }
 0x2fa   : > { %v1639_v26 = vsel %vm772_vm13, 1.0, %v1900_v36  ;;  %v804_v28 = vsel %vm772_vm13, -1e+30, %v740_v50 }
 0x2fb   : > { %v796_v31 = vadd.f32 %v1639_v26, %v732_v51  ;;  %v816_v21 = vsel %vm561_vm0, %v804_v28, -inf }
 0x2fc   : > { %817 = vmax.xlane.f32.xlu1 %v816_v21 }
 0x308   : > { %v763_v27 = vpop.xlane.xlu0 %762 }
 0x309   : > { %vm775_vm14 = vcmp.eq.f32.partialorder %v743_v56, %v763_v27 }
 0x30a   : > { %v1642_v29 = vsel %vm775_vm14, 1.0, %v1900_v36  ;;  %v807_v32 = vsel %vm775_vm14, -1e+30, %v743_v56 }
 0x30b   : > { %v799_v39 = vadd.f32 %v1642_v29, %v735_v62  ;;  %v760_v41 = vpop.xlane.xlu1 %759  ;;  %v825_v44 = vsel %vm561_vm0, %v807_v32, -inf }
 0x30c   : > { %vm774_vm15 = vcmp.eq.f32.partialorder %v742_v58, %v760_v41  ;;  %826 = vmax.xlane.f32.xlu0 %v825_v44 }
 0x30d   : > { %v1641_v45 = vsel %vm774_vm15, 1.0, %v1900_v36  ;;  %v806_v46 = vsel %vm774_vm15, -1e+30, %v742_v58 }
 0x30e   : > { %v798_v42 = vadd.f32 %v1641_v45, %v734_v5  ;;  %v822_v47 = vsel %vm561_vm0, %v806_v46, -inf }
 0x30f   : > { %823 = vmax.xlane.f32.xlu1 %v822_v47 }
 0x31b   : > { %v769_v43 = vpop.xlane.xlu0 %768 }
 0x31c   : > { %vm777_vm1 = vcmp.eq.f32.partialorder %v745_v0, %v769_v43 }
 0x31d   : > { %v1644_v49 = vsel %vm777_vm1, 1.0, %v1900_v36  ;;  %v809_v50 = vsel %vm777_vm1, -1e+30, %v745_v0 }
 0x31e   : > { %v801_v51 = vadd.f32 %v1644_v49, %v737_v25  ;;  %v766_v38 = vpop.xlane.xlu1 %765  ;;  %v831_v48 = vsel %vm561_vm0, %v809_v50, -inf }
 0x31f   : > { %vm776_vm2 = vcmp.eq.f32.partialorder %v744_v9, %v766_v38  ;;  %832 = vmax.xlane.f32.xlu0 %v831_v48 }
 0x320   : > { %v1643_v52 = vsel %vm776_vm2, 1.0, %v1900_v36  ;;  %v808_v56 = vsel %vm776_vm2, -1e+30, %v744_v9 }
 0x321   : > { %v800_v62 = vadd.f32 %v1643_v52, %v736_v7  ;;  %v828_v53 = vsel %vm561_vm0, %v808_v56, -inf }
 0x322   : > { %829 = vmax.xlane.f32.xlu1 %v828_v53 }
 0x376   : > { %v812_v54 = vpop.xlane.xlu1 %811 }
 0x377   : > { %vm834_vm3 = vcmp.eq.f32.partialorder %v802_v33, %v812_v54 }
 0x378   : > { %v1645_v57 = vsel %vm834_vm3, 1.0, %v1900_v36  ;;  %v866_v58 = vsel %vm834_vm3, -1e+30, %v802_v33 }
 0x379   : > { %v858_v5 = vadd.f32 %v1645_v57, %v794_v12  ;;  %v874_v37 = vsel %vm561_vm0, %v866_v58, -inf }
 0x37a   : > { %875 = vmax.xlane.f32.xlu1 %v874_v37 }
 0x382   : > { %v815_v60 = vpop.xlane.xlu0 %814 }
 0x383   : > { %vm835_vm4 = vcmp.eq.f32.partialorder %v803_v16, %v815_v60 }
 0x384   : > { %v1646_v18 = vsel %vm835_vm4, 1.0, %v1900_v36  ;;  %v867_v0 = vsel %vm835_vm4, -1e+30, %v803_v16 }
 0x385   : > { %v859_v25 = vadd.f32 %v1646_v18, %v795_v17  ;;  %v877_v2 = vsel %vm561_vm0, %v867_v0, -inf }
 0x386   : > { %878 = vmax.xlane.f32.xlu0 %v877_v2  ;;  %v821_v3 = vpop.xlane.xlu0 %820 }
 0x387   : > { %vm837_vm5 = vcmp.eq.f32.partialorder %v805_v61, %v821_v3 }
 0x388   : > { %v1648_v4 = vsel %vm837_vm5, 1.0, %v1900_v36  ;;  %v869_v9 = vsel %vm837_vm5, -1e+30, %v805_v61 }
 0x389   : > { %v861_v7 = vadd.f32 %v1648_v4, %v797_v22  ;;  %v818_v8 = vpop.xlane.xlu1 %817  ;;  %v883_v10 = vsel %vm561_vm0, %v869_v9, -inf }
 0x38a   : > { %vm836_vm6 = vcmp.eq.f32.partialorder %v804_v28, %v818_v8  ;;  %884 = vmax.xlane.f32.xlu0 %v883_v10 }
 0x38b   : > { %v1647_v11 = vsel %vm836_vm6, 1.0, %v1900_v36  ;;  %v868_v33 = vsel %vm836_vm6, -1e+30, %v804_v28 }
 0x38c   : > { %v860_v12 = vadd.f32 %v1647_v11, %v796_v31  ;;  %v880_v13 = vsel %vm561_vm0, %v868_v33, -inf }
 0x38d   : > { %881 = vmax.xlane.f32.xlu1 %v880_v13 }
 0x399   : > { %v827_v14 = vpop.xlane.xlu0 %826 }
 0x39a   : > { %vm839_vm7 = vcmp.eq.f32.partialorder %v807_v32, %v827_v14 }
 0x39b   : > { %v1650_v15 = vsel %vm839_vm7, 1.0, %v1900_v36  ;;  %v871_v16 = vsel %vm839_vm7, -1e+30, %v807_v32 }
 0x39c   : > { %v863_v17 = vadd.f32 %v1650_v15, %v799_v39  ;;  %v824_v40 = vpop.xlane.xlu1 %823  ;;  %v889_v19 = vsel %vm561_vm0, %v871_v16, -inf }
 0x39d   : > { %vm838_vm8 = vcmp.eq.f32.partialorder %v806_v46, %v824_v40  ;;  %890 = vmax.xlane.f32.xlu0 %v889_v19 }
 0x39e   : > { %v1649_v20 = vsel %vm838_vm8, 1.0, %v1900_v36  ;;  %v870_v61 = vsel %vm838_vm8, -1e+30, %v806_v46 }
 0x39f   : > { %v862_v22 = vadd.f32 %v1649_v20, %v798_v42  ;;  %v886_v23 = vsel %vm561_vm0, %v870_v61, -inf }
 0x3a0   : > { %887 = vmax.xlane.f32.xlu1 %v886_v23 }
 0x3ac   : > { %v833_v24 = vpop.xlane.xlu0 %832 }
 0x3ad   : > { %vm841_vm9 = vcmp.eq.f32.partialorder %v809_v50, %v833_v24 }
 0x3ae   : > { %v1652_v26 = vsel %vm841_vm9, 1.0, %v1900_v36  ;;  %v873_v28 = vsel %vm841_vm9, -1e+30, %v809_v50 }
 0x3af   : > { %v865_v31 = vadd.f32 %v1652_v26, %v801_v51  ;;  %v830_v21 = vpop.xlane.xlu1 %829  ;;  %v895_v27 = vsel %vm561_vm0, %v873_v28, -inf }
 0x3b0   : > { %vm840_vm10 = vcmp.eq.f32.partialorder %v808_v56, %v830_v21  ;;  %896 = vmax.xlane.f32.xlu0 %v895_v27 }
 0x3b1   : > { %v1651_v29 = vsel %vm840_vm10, 1.0, %v1900_v36  ;;  %v872_v32 = vsel %vm840_vm10, -1e+30, %v808_v56 }
 0x3b2   : > { %v864_v39 = vadd.f32 %v1651_v29, %v800_v62  ;;  %v892_v41 = vsel %vm561_vm0, %v872_v32, -inf }
 0x3b3   : > { %893 = vmax.xlane.f32.xlu1 %v892_v41 }
 0x407   : > { %v876_v44 = vpop.xlane.xlu1 %875 }
 0x408   : > { %vm898_vm11 = vcmp.eq.f32.partialorder %v866_v58, %v876_v44 }
 0x409   : > { %v1653_v45 = vsel %vm898_vm11, 1.0, %v1900_v36  ;;  %v930_v46 = vsel %vm898_vm11, -1e+30, %v866_v58 }
 0x40a   : > { %v922_v42 = vadd.f32 %v1653_v45, %v858_v5  ;;  %v938_v47 = vsel %vm561_vm0, %v930_v46, -inf }
 0x40b   : > { %939 = vmax.xlane.f32.xlu1 %v938_v47 }
 0x413   : > { %v879_v43 = vpop.xlane.xlu0 %878 }
 0x414   : > { %vm899_vm12 = vcmp.eq.f32.partialorder %v867_v0, %v879_v43 }
 0x415   : > { %v1654_v49 = vsel %vm899_vm12, 1.0, %v1900_v36  ;;  %v931_v50 = vsel %vm899_vm12, -1e+30, %v867_v0 }
 0x416   : > { %v923_v51 = vadd.f32 %v1654_v49, %v859_v25  ;;  %v941_v38 = vsel %vm561_vm0, %v931_v50, -inf }
 0x417   : > { %942 = vmax.xlane.f32.xlu0 %v941_v38  ;;  %v885_v48 = vpop.xlane.xlu0 %884 }
 0x418   : > { %vm901_vm13 = vcmp.eq.f32.partialorder %v869_v9, %v885_v48 }
 0x419   : > { %v1656_v52 = vsel %vm901_vm13, 1.0, %v1900_v36  ;;  %v933_v56 = vsel %vm901_vm13, -1e+30, %v869_v9 }
 0x41a   : > { %v925_v62 = vadd.f32 %v1656_v52, %v861_v7  ;;  %v882_v53 = vpop.xlane.xlu1 %881  ;;  %v947_v54 = vsel %vm561_vm0, %v933_v56, -inf }
 0x41b   : > { %vm900_vm14 = vcmp.eq.f32.partialorder %v868_v33, %v882_v53  ;;  %948 = vmax.xlane.f32.xlu0 %v947_v54 }
 0x41c   : > { %v1655_v57 = vsel %vm900_vm14, 1.0, %v1900_v36  ;;  %v932_v58 = vsel %vm900_vm14, -1e+30, %v868_v33 }
 0x41d   : > { %v924_v5 = vadd.f32 %v1655_v57, %v860_v12  ;;  %v944_v37 = vsel %vm561_vm0, %v932_v58, -inf }
 0x41e   : > { %945 = vmax.xlane.f32.xlu1 %v944_v37 }
 0x42a   : > { %v891_v60 = vpop.xlane.xlu0 %890 }
 0x42b   : > { %vm903_vm15 = vcmp.eq.f32.partialorder %v871_v16, %v891_v60 }
 0x42c   : > { %v1658_v18 = vsel %vm903_vm15, 1.0, %v1900_v36  ;;  %v935_v0 = vsel %vm903_vm15, -1e+30, %v871_v16 }
 0x42d   : > { %v927_v25 = vadd.f32 %v1658_v18, %v863_v17  ;;  %v888_v2 = vpop.xlane.xlu1 %887  ;;  %v953_v3 = vsel %vm561_vm0, %v935_v0, -inf }
 0x42e   : > { %vm902_vm1 = vcmp.eq.f32.partialorder %v870_v61, %v888_v2  ;;  %954 = vmax.xlane.f32.xlu0 %v953_v3  ;;  %v1058_v3 = vadd.f32 1e-08, %v1986_v34 }
 0x42f   : > { %v1657_v4 = vsel %vm902_vm1, 1.0, %v1900_v36  ;;  %v934_v9 = vsel %vm902_vm1, -1e+30, %v870_v61 }
 0x430   : > { %v926_v7 = vadd.f32 %v1657_v4, %v862_v22  ;;  %v950_v8 = vsel %vm561_vm0, %v934_v9, -inf  ;;  %1841 = vrcp.f32 %v1058_v3  ;;  %v1059_v4 = vadd.f32 1e-08, %v2002_v55 }
 0x431   : > { %951 = vmax.xlane.f32.xlu1 %v950_v8 }
 0x432   : > { %1843 = vrcp.f32 %v1059_v4 }
 0x43d   : > { %v897_v10 = vpop.xlane.xlu0 %896 }
 0x43e   : > { %vm905_vm2 = vcmp.eq.f32.partialorder %v873_v28, %v897_v10  ;;  %v1060_v10 = vadd.f32 1e-08, %v2016_v6 }
 0x43f   : > { %v1660_v11 = vsel %vm905_vm2, 1.0, %v1900_v36  ;;  %v937_v33 = vsel %vm905_vm2, -1e+30, %v873_v28 }
 0x440   : > { %v929_v12 = vadd.f32 %v1660_v11, %v865_v31  ;;  %v894_v13 = vpop.xlane.xlu1 %893  ;;  %v959_v14 = vsel %vm561_vm0, %v937_v33, -inf }
 0x441   : > { %vm904_vm3 = vcmp.eq.f32.partialorder %v872_v32, %v894_v13  ;;  %960 = vmax.xlane.f32.xlu0 %v959_v14 }
 0x442   : > { %v1659_v15 = vsel %vm904_vm3, 1.0, %v1900_v36  ;;  %v936_v16 = vsel %vm904_vm3, -1e+30, %v872_v32  ;;  %vm1317_vm3 = vcmask 130048  }
 0x443   : > { %v928_v17 = vadd.f32 %v1659_v15, %v864_v39  ;;  %v956_v40 = vsel %vm561_vm0, %v936_v16, -inf }
 0x444   : > { %957 = vmax.xlane.f32.xlu1 %v956_v40 }
 0x498   : > { %v940_v19 = vpop.xlane.xlu1 %939 }
 0x499   : > { %vm962_vm4 = vcmp.eq.f32.partialorder %v930_v46, %v940_v19 }
 0x49a   : > { %v1661_v20 = vsel %vm962_vm4, 1.0, %v1900_v36  ;;  %v2229_v61 = vsel %vm962_vm4, -1e+30, %v930_v46 }
 0x49b   : > { %v2231_v22 = vadd.f32 %v1661_v20, %v922_v42  ;;  %v1002_v23 = vsel %vm561_vm0, %v2229_v61, -inf  ;;  %v1063_v20 = vadd.f32 1e-08, %v2031_v30 }
 0x49c   : > { %1003 = vmax.xlane.f32.xlu1 %v1002_v23 }
 0x4a4   : > { %v943_v24 = vpop.xlane.xlu0 %942 }
 0x4a5   : > { %vm963_vm5 = vcmp.eq.f32.partialorder %v931_v50, %v943_v24 }
 0x4a6   : > { %v1662_v26 = vsel %vm963_vm5, 1.0, %v1900_v36  ;;  %v2236_v28 = vsel %vm963_vm5, -1e+30, %v931_v50 }
 0x4a7   : > { %v2238_v31 = vadd.f32 %v1662_v26, %v923_v51  ;;  %v1005_v21 = vsel %vm561_vm0, %v2236_v28, -inf }
 0x4a8   : > { %1006 = vmax.xlane.f32.xlu0 %v1005_v21  ;;  %v949_v27 = vpop.xlane.xlu0 %948  ;;  %v1062_v21 = vadd.f32 1e-08, %v2036_v35 }
 0x4a9   : > { %vm965_vm6 = vcmp.eq.f32.partialorder %v933_v56, %v949_v27 }
 0x4aa   : > { %v1664_v29 = vsel %vm965_vm6, 1.0, %v1900_v36  ;;  %v2243_v32 = vsel %vm965_vm6, -1e+30, %v933_v56 }
 0x4ab   : > { %v2245_v39 = vadd.f32 %v1664_v29, %v925_v62  ;;  %v946_v41 = vpop.xlane.xlu1 %945  ;;  %v1011_v44 = vsel %vm561_vm0, %v2243_v32, -inf }
 0x4ac   : > { %vm964_vm7 = vcmp.eq.f32.partialorder %v932_v58, %v946_v41  ;;  %1012 = vmax.xlane.f32.xlu0 %v1011_v44 }
 0x4ad   : > { %v1663_v45 = vsel %vm964_vm7, 1.0, %v1900_v36  ;;  %v2250_v46 = vsel %vm964_vm7, -1e+30, %v932_v58 }
 0x4ae   : > { %v2252_v42 = vadd.f32 %v1663_v45, %v924_v5  ;;  %v1008_v47 = vsel %vm561_vm0, %v2250_v46, -inf }
 0x4af   : > { %1009 = vmax.xlane.f32.xlu1 %v1008_v47 }
 0x4bb   : > { %v955_v43 = vpop.xlane.xlu0 %954 }
 0x4bc   : > { %vm967_vm8 = vcmp.eq.f32.partialorder %v935_v0, %v955_v43 }
 0x4bd   : > { %v1666_v49 = vsel %vm967_vm8, 1.0, %v1900_v36  ;;  %v2257_v50 = vsel %vm967_vm8, -1e+30, %v935_v0 }
 0x4be   : > { %v2259_v51 = vadd.f32 %v1666_v49, %v927_v25  ;;  %v952_v38 = vpop.xlane.xlu1 %951  ;;  %v1017_v48 = vsel %vm561_vm0, %v2257_v50, -inf }
 0x4bf   : > { %vm966_vm9 = vcmp.eq.f32.partialorder %v934_v9, %v952_v38  ;;  %1018 = vmax.xlane.f32.xlu0 %v1017_v48 }
 0x4c0   : > { %v1665_v52 = vsel %vm966_vm9, 1.0, %v1900_v36  ;;  %v2264_v56 = vsel %vm966_vm9, -1e+30, %v934_v9  ;;  %v1842_v9 = vpop.eup %1841 }
 0x4c1   : > { %v2266_v62 = vadd.f32 %v1665_v52, %v926_v7  ;;  %v1014_v53 = vsel %vm561_vm0, %v2264_v56, -inf  ;;  %v1061_v7 = vadd.f32 1e-08, %v2009_v1  ;;  %v1074_v8 = vmul.f32 %v1842_v9, %v1058_v3  ;;  %v1844_v14 = vpop.eup %1843 }
 0x4c2   : > { %1015 = vmax.xlane.f32.xlu1 %v1014_v53  ;;  %v1075_v15 = vmul.f32 %v1844_v14, %v1059_v4  ;;  %v1065_v53 = vadd.f32 1e-08, %v2052_v59 }
 0x4c3   : > { %1845 = vrcp.f32 %v1061_v7  ;;  %v1082_v11 = vsub.f32 2.0, %v1074_v8  ;;  %v1172_v8 = vld [vmem:[%s2323_s11 + $0x10] sm:$0xff] }
 0x4c4   : > { %1847 = vrcp.f32 %v1060_v10 }
 0x4c5   : > { %v1090_v13 = vmul.f32 %v1842_v9, %v1082_v11  ;;  %1849 = vrcp.f32 %v1063_v20 }
 0x4c6   : > { %1851 = vrcp.f32 %v1062_v21 }
 0x4c7   : > { %1853 = vrcp.f32 %v1065_v53 }
 0x4ce   : > { %v961_v54 = vpop.xlane.xlu0 %960 }
 0x4cf   : > { %vm969_vm10 = vcmp.eq.f32.partialorder %v937_v33, %v961_v54 }
 0x4d0   : > { %v1668_v57 = vsel %vm969_vm10, 1.0, %v1900_v36  ;;  %v2271_v58 = vsel %vm969_vm10, -1e+30, %v937_v33 }
 0x4d1   : > { %v2273_v5 = vadd.f32 %v1668_v57, %v929_v12  ;;  %v958_v37 = vpop.xlane.xlu1 %957  ;;  %v1023_v60 = vsel %vm561_vm0, %v2271_v58, -inf  ;;  %v1170_v57 = vld [vmem:[%s2323_s11] sm:$0xff] }
 0x4d2   : > { %vm968_vm11 = vcmp.eq.f32.partialorder %v936_v16, %v958_v37  ;;  %1024 = vmax.xlane.f32.xlu0 %v1023_v60  ;;  %v1171_v37 = vld [vmem:[%s2323_s11 + $0x8] sm:$0xff]  ;;  %v1064_v60 = vadd.f32 1e-08, %v2057_v63 }
 0x4d3   : > { %v1667_v18 = vsel %vm968_vm11, 1.0, %v1900_v36  ;;  %v2278_v0 = vsel %vm968_vm11, -1e+30, %v936_v16  ;;  %v1846_v16 = vpop.eup %1845 }
 0x4d4   : > { %v2280_v25 = vadd.f32 %v1667_v18, %v928_v17  ;;  %v1020_v2 = vsel %vm561_vm0, %v2278_v0, -inf  ;;  %v1848_v6 = vpop.eup %1847  ;;  %v1083_v17 = vsub.f32 2.0, %v1075_v15  ;;  %v1077_v40 = vmul.f32 %v1846_v16, %v1061_v7 }
 0x4d5   : > { %1021 = vmax.xlane.f32.xlu1 %v1020_v2  ;;  %v1850_v48 = vpop.eup %1849  ;;  %v1770_v2 = vpack.c.bf16 %v1171_v37, %v1170_v57  ;;  %1855 = vrcp.f32 %v1064_v60 }
 0x4d6   : > { %v1091_v24 = vmul.f32 %v1844_v14, %v1083_v17  ;;  %v1085_v26 = vsub.f32 2.0, %v1077_v40  ;;  %v1079_v52 = vmul.f32 %v1850_v48, %v1063_v20  ;;  %v1316_v40 = vld [vmem:[%s2434_s4 + $0x8] sm:$0xff] }
 0x4d7   : > { %1771 = vmatprep.subr.bf16.mxu1 %v1770_v2 }
 0x4d8   : > { %1773 = vmatpush3.bf16.msra.mxu1 %v1770_v2 }
 0x529   : > { %v1004_v33 = vpop.xlane.xlu1 %1003 }
 0x52a   : > { %vm1026_vm12 = vcmp.eq.f32.partialorder %v2229_v61, %v1004_v33 }
 0x52b   : > { %v1669_v12 = vsel %vm1026_vm12, 1.0, %v1900_v36 }
 0x52c   : > { %v1050_v34 = vadd.f32 %v1669_v12, %v2231_v22  ;;  %v1076_v22 = vmul.f32 %v1848_v6, %v1060_v10  ;;  %v1173_v10 = vld [vmem:[%s2323_s11 + $0x18] sm:$0xff] }
 0x52d   : > { %v1774_v63 = vpack.c.bf16 %v1173_v10, %v1172_v8 }
 0x52e   : > { %v2291_v55 = vmul.f32 %v1090_v13, %v1050_v34  ;;  %v1084_v30 = vsub.f32 2.0, %v1076_v22  ;;  %v1174_v34 = vld [vmem:[%s2323_s11 + $0x20] sm:$0xff]  ;;  %v1175_v13 = vld [vmem:[%s2323_s11 + $0x28] sm:$0xff] }
 0x52f   : > { %1775 = vmatprep.subr.bf16.mxu1 %v1774_v63  ;;  %v1307_v22 = vld [vmem:[%s2358_s18] sm:$0xff] }
 0x530   : > { %v1106_v1 = vsel %vm561_vm0, %v2291_v55, 0.0  ;;  %v1092_v43 = vmul.f32 %v1848_v6, %v1084_v30  ;;  %1777 = vmatpush3.bf16.msra.mxu1 %v1774_v63  ;;  %v1315_v6 = vld [vmem:[%s2434_s4] sm:$0xff]  ;;  %1758 = vmatprep.mubr.msk.f32.mxu0 %vm1317_vm3, %v1307_v22 }
 0x531   : > { %1107 = vadd.xlane.f32.xlu1 %v1106_v1 }
 0x535   : > { %v1007_v19 = vpop.xlane.xlu0 %1006 }
 0x536   : > { %vm1027_vm13 = vcmp.eq.f32.partialorder %v2236_v28, %v1007_v19  ;;  %v1786_v19 = vpack.c.bf16 %v1316_v40, %v1315_v6 }
 0x537   : > { %v1670_v61 = vsel %vm1027_vm13, 1.0, %v1900_v36 }
 0x538   : > { %v1051_v23 = vadd.f32 %v1670_v61, %v2238_v31  ;;  %v1093_v31 = vmul.f32 %v1846_v16, %v1085_v26  ;;  %v1177_v16 = vld [vmem:[%s2323_s11 + $0x38] sm:$0xff]  ;;  %1787 = vmatprep.subr.bf16.mxu0 %v1786_v19 }
 0x539   : > { %v1013_v27 = vpop.xlane.xlu0 %1012  ;;  %1789 = vmatpush3.bf16.msra.mxu0 %v1786_v19 }
 0x53a   : > { %vm1029_vm14 = vcmp.eq.f32.partialorder %v2243_v32, %v1013_v27  ;;  %v2301_v29 = vmul.f32 %v1091_v24, %v1051_v23  ;;  %v1308_v24 = vld [vmem:[%s2358_s18 + $0x8] sm:$0xff] }
 0x53b   : > { %v1672_v41 = vsel %vm1029_vm14, 1.0, %v1900_v36 }
 0x53c   : > { %v1053_v28 = vadd.f32 %v1672_v41, %v2245_v39  ;;  %v1010_v44 = vpop.xlane.xlu1 %1009  ;;  %v1109_v45 = vsel %vm561_vm0, %v2301_v29, 0.0  ;;  %1759 = vmatmul.mubr.msk.f32.vlgmr.msra.gmra.mrb[0].mxu0 %vm1317_vm3, %v1308_v24 }
 0x53d   : > { %vm1028_vm15 = vcmp.eq.f32.partialorder %v2250_v46, %v1010_v44  ;;  %1110 = vadd.xlane.f32.xlu0 %v1109_v45  ;;  %v1852_v46 = vpop.eup %1851 }
 0x53e   : > { %v1671_v35 = vsel %vm1028_vm15, 1.0, %v1900_v36  ;;  %v2309_v32 = vmul.f32 %v1093_v31, %v1053_v28  ;;  %v1078_v54 = vmul.f32 %v1852_v46, %v1062_v21  ;;  %v1854_v15 = vpop.eup %1853 }
 0x53f   : > { %v1052_v47 = vadd.f32 %v1671_v35, %v2252_v42  ;;  %v1087_v42 = vsub.f32 2.0, %v1079_v52  ;;  %v1856_v20 = vpop.eup %1855  ;;  %v1081_v61 = vmul.f32 %v1854_v15, %v1065_v53  ;;  %v1309_v35 = vld [vmem:[%s2358_s18 + $0x10] sm:$0xff] }
 0x540   : > { %v1115_v39 = vsel %vm561_vm0, %v2309_v32, 0.0  ;;  %v1086_v59 = vsub.f32 2.0, %v1078_v54  ;;  %v1080_v23 = vmul.f32 %v1856_v20, %v1064_v60  ;;  %1761 = vmatprep.mubr.msk.f32.mxu0 %vm1317_vm3, %v1309_v35 }
 0x541   : > { %1116 = vadd.xlane.f32.xlu0 %v1115_v39  ;;  %v2314_v49 = vmul.f32 %v1092_v43, %v1052_v47  ;;  %v1095_v7 = vmul.f32 %v1850_v48, %v1087_v42  ;;  %v1089_v26 = vsub.f32 2.0, %v1081_v61  ;;  %v1310_v43 = vld [vmem:[%s2358_s18 + $0x18] sm:$0xff]  ;;  %v1311_v39 = vld [vmem:[%s2358_s18 + $0x20] sm:$0xff] }
 0x542   : > { %v1088_v27 = vsub.f32 2.0, %v1080_v23  ;;  %1762 = vmatmul.mubr.msk.f32.gmra.mrb[2].mxu0 %vm1317_vm3, %v1310_v43  ;;  %v1314_v48 = vld [vmem:[%s2358_s18 + $0x38] sm:$0xff] }
 0x543   : > { %v1112_v38 = vsel %vm561_vm0, %v2314_v49, 0.0  ;;  %v1097_v44 = vmul.f32 %v1854_v15, %v1089_v26  ;;  %1764 = vmatprep.mubr.msk.f32.mxu0 %vm1317_vm3, %v1311_v39 }
 0x544   : > { %1113 = vadd.xlane.f32.xlu1 %v1112_v38  ;;  %v1313_v38 = vld [vmem:[%s2358_s18 + $0x30] sm:$0xff] }
 0x54c   : > { %v1019_v18 = vpop.xlane.xlu0 %1018 }
 0x54d   : > { %vm1031_vm1 = vcmp.eq.f32.partialorder %v2257_v50, %v1019_v18 }
 0x54e   : > { %v1674_v3 = vsel %vm1031_vm1, 1.0, %v1900_v36 }
 0x54f   : > { %v1055_v4 = vadd.f32 %v1674_v3, %v2259_v51  ;;  %v1016_v9 = vpop.xlane.xlu1 %1015  ;;  %v1094_v51 = vmul.f32 %v1852_v46, %v1086_v59 }
 0x550   : > { %vm1030_vm2 = vcmp.eq.f32.partialorder %v2264_v56, %v1016_v9  ;;  %v1778_v56 = vpack.c.bf16 %v1175_v13, %v1174_v34 }
 0x551   : > { %v1673_v11 = vsel %vm1030_vm2, 1.0, %v1900_v36  ;;  %v2335_v50 = vmul.f32 %v1095_v7, %v1055_v4 }
 0x552   : > { %v1054_v33 = vadd.f32 %v1673_v11, %v2266_v62  ;;  %1779 = vmatprep.subr.bf16.mxu1 %v1778_v56  ;;  %v1176_v62 = vld [vmem:[%s2323_s11 + $0x30] sm:$0xff] }
 0x553   : > { %v1121_v12 = vsel %vm561_vm0, %v2335_v50, 0.0  ;;  %1781 = vmatpush3.bf16.msra.mxu1 %v1778_v56  ;;  %v1782_v17 = vpack.c.bf16 %v1177_v16, %v1176_v62 }
 0x554   : > { %1122 = vadd.xlane.f32.xlu0 %v1121_v12  ;;  %v2342_v14 = vmul.f32 %v1094_v51, %v1054_v33 }
 0x555   : > { %1783 = vmatprep.subr.bf16.mxu1 %v1782_v17 }
 0x556   : > { %v1118_v1 = vsel %vm561_vm0, %v2342_v14, 0.0 }
 0x557   : > { %1119 = vadd.xlane.f32.xlu1 %v1118_v1  ;;  %1785 = vmatpush3.bf16.msra.mxu1 %v1782_v17 }
 0x55f   : > { %v1025_v21 = vpop.xlane.xlu0 %1024 }
 0x560   : > { %vm1033_vm4 = vcmp.eq.f32.partialorder %v2271_v58, %v1025_v21  ;;  %v1096_v58 = vmul.f32 %v1856_v20, %v1088_v27 }
 0x561   : > { %v1676_v41 = vsel %vm1033_vm4, 1.0, %v1900_v36 }
 0x562   : > { %v1057_v30 = vadd.f32 %v1676_v41, %v2273_v5  ;;  %v1022_v28 = vpop.xlane.xlu1 %1021 }
 0x563   : > { %vm1032_vm5 = vcmp.eq.f32.partialorder %v2278_v0, %v1022_v28 }
 0x564   : > { %v1675_v45 = vsel %vm1032_vm5, 1.0, %v1900_v36  ;;  %v2369_v31 = vmul.f32 %v1097_v44, %v1057_v30 }
 0x565   : > { %v1056_v47 = vadd.f32 %v1675_v45, %v2280_v25  ;;  %v1312_v25 = vld [vmem:[%s2358_s18 + $0x28] sm:$0xff] }
 0x566   : > { %v1127_v5 = vsel %vm561_vm0, %v2369_v31, 0.0  ;;  %1765 = vmatmul.mubr.msk.f32.gmra.mrb[4].mxu0 %vm1317_vm3, %v1312_v25 }
 0x567   : > { %1128 = vadd.xlane.f32.xlu0 %v1127_v5  ;;  %v2378_v0 = vmul.f32 %v1096_v58, %v1056_v47  ;;  %1767 = vmatprep.mubr.msk.f32.mxu0 %vm1317_vm3, %v1313_v38 }
 0x569   : > { %v1124_v36 = vsel %vm561_vm0, %v2378_v0, 0.0 }
 0x56a   : > { %1125 = vadd.xlane.f32.xlu1 %v1124_v36  ;;  %1768 = vmatmul.mubr.msk.f32.gmra.mrb[6].mxu0 %vm1317_vm3, %v1314_v48 }
 0x5be   : > { %v1108_v46 = vpop.xlane.xlu1 %1107 }
 0x5bf   : > { %1857 = vrcp.f32 %v1108_v46 }
 0x5c9   : > { %v1858_v52 = vpop.eup %1857 }
 0x5ca   : > { %v1138_v53 = vmul.f32 %v1858_v52, %v1108_v46  ;;  %v1111_v54 = vpop.xlane.xlu0 %1110 }
 0x5cb   : > { %1859 = vrcp.f32 %v1111_v54 }
 0x5cc   : > { %v1146_v42 = vsub.f32 2.0, %v1138_v53 }
 0x5ce   : > { %v1117_v57 = vpop.xlane.xlu0 %1116  ;;  %v1154_v37 = vmul.f32 %v1858_v52, %v1146_v42 }
 0x5cf   : > { %1861 = vrcp.f32 %v1117_v57 }
 0x5d0   : > { %v1162_v60 = vmul.f32 %v1154_v37, %v2291_v55 }
 0x5d1   : > { %v1114_v18 = vpop.xlane.xlu1 %1113 }
 0x5d2   : > { %1863 = vrcp.f32 %v1114_v18  ;;  %1742 = vmatprep.mubr.msk.f32.mxu1 %vm561_vm0, %v1162_v60 }
 0x5d5   : > { %v1860_v2 = vpop.eup %1859 }
 0x5d6   : > { %v1139_v59 = vmul.f32 %v1860_v2, %v1111_v54 }
 0x5d8   : > { %v1147_v3 = vsub.f32 2.0, %v1139_v59 }
 0x5d9   : > { %v1862_v4 = vpop.eup %1861 }
 0x5da   : > { %v1155_v9 = vmul.f32 %v1860_v2, %v1147_v3  ;;  %v1141_v7 = vmul.f32 %v1862_v4, %v1117_v57 }
 0x5dc   : > { %v1864_v8 = vpop.eup %1863  ;;  %v1163_v10 = vmul.f32 %v1155_v9, %v2301_v29  ;;  %v1149_v63 = vsub.f32 2.0, %v1141_v7 }
 0x5dd   : > { %v1140_v11 = vmul.f32 %v1864_v8, %v1114_v18 }
 0x5de   : > { %1743 = vmatmul.mubr.msk.f32.vlgmr.msra.gmra.mrb[0].mxu1 %vm561_vm0, %v1163_v10  ;;  %v1157_v51 = vmul.f32 %v1862_v4, %v1149_v63 }
 0x5df   : > { %v1148_v33 = vsub.f32 2.0, %v1140_v11 }
 0x5e0   : > { %v1165_v13 = vmul.f32 %v1157_v51, %v2309_v32 }
 0x5e1   : > { %v1156_v55 = vmul.f32 %v1864_v8, %v1148_v33  ;;  %v1123_v12 = vpop.xlane.xlu0 %1122 }
 0x5e2   : > { %1865 = vrcp.f32 %v1123_v12 }
 0x5e3   : > { %v1164_v34 = vmul.f32 %v1156_v55, %v2314_v49 }
 0x5e4   : > { %v1120_v56 = vpop.xlane.xlu1 %1119 }
 0x5e5   : > { %1867 = vrcp.f32 %v1120_v56  ;;  %1745 = vmatprep.mubr.msk.f32.mxu1 %vm561_vm0, %v1164_v34 }
 0x5e6   : > { %1746 = vmatmul.mubr.msk.f32.gmra.mrb[2].mxu1 %vm561_vm0, %v1165_v13 }
 0x5ec   : > { %v1866_v29 = vpop.eup %1865 }
 0x5ed   : > { %v1143_v1 = vmul.f32 %v1866_v29, %v1123_v12 }
 0x5ef   : > { %v1868_v15 = vpop.eup %1867  ;;  %v1151_v62 = vsub.f32 2.0, %v1143_v1 }
 0x5f0   : > { %v1142_v16 = vmul.f32 %v1868_v15, %v1120_v56 }
 0x5f1   : > { %v1159_v17 = vmul.f32 %v1866_v29, %v1151_v62 }
 0x5f2   : > { %v1150_v6 = vsub.f32 2.0, %v1142_v16 }
 0x5f3   : > { %v1167_v32 = vmul.f32 %v1159_v17, %v2335_v50 }
 0x5f4   : > { %v1158_v40 = vmul.f32 %v1868_v15, %v1150_v6  ;;  %v1129_v19 = vpop.xlane.xlu0 %1128 }
 0x5f5   : > { %1869 = vrcp.f32 %v1129_v19 }
 0x5f6   : > { %v1166_v49 = vmul.f32 %v1158_v40, %v2342_v14 }
 0x5f7   : > { %v1126_v20 = vpop.xlane.xlu1 %1125 }
 0x5f8   : > { %1871 = vrcp.f32 %v1126_v20  ;;  %1748 = vmatprep.mubr.msk.f32.mxu1 %vm561_vm0, %v1166_v49 }
 0x5f9   : > { %1749 = vmatmul.mubr.msk.f32.gmra.mrb[4].mxu1 %vm561_vm0, %v1167_v32 }
 0x5ff   : > { %v1870_v61 = vpop.eup %1869 }
 0x600   : > { %v1145_v22 = vmul.f32 %v1870_v61, %v1129_v19 }
 0x602   : > { %v1872_v23 = vpop.eup %1871  ;;  %v1153_v24 = vsub.f32 2.0, %v1145_v22 }
 0x603   : > { %v1144_v26 = vmul.f32 %v1872_v23, %v1126_v20 }
 0x604   : > { %v1161_v27 = vmul.f32 %v1870_v61, %v1153_v24 }
 0x605   : > { %v1152_v21 = vsub.f32 2.0, %v1144_v26 }
 0x606   : > { %v1169_v14 = vmul.f32 %v1161_v27, %v2369_v31 }
 0x607   : > { %v1160_v41 = vmul.f32 %v1872_v23, %v1152_v21 }
 0x609   : > { %v1168_v30 = vmul.f32 %v1160_v41, %v2378_v0  ;;  %v1693_v0 = vld [vmem:[%s2435_s5] ss:$0 sm:$0xff] }
 0x60b   : > { %1751 = vmatprep.mubr.msk.f32.mxu1 %vm561_vm0, %v1168_v30 }
 0x60c   : > { %1752 = vmatmul.mubr.msk.f32.gmra.mrb[6].mxu1 %vm561_vm0, %v1169_v14 }
 0x60f   : > { %v1760_v50 = vpop.f32.mrb[0].mxu0 }
 0x610   : > { %v1408_v28 = vpop.f32.mrb[1].mxu0 }
 0x615   : > { %v1763_v44 = vpop.f32.mrb[2].mxu0 }
 0x616   : > { %v1418_v45 = vpop.f32.mrb[3].mxu0 }
 0x639   : > { %v1766_v35 = vpop.f32.mrb[4].mxu0 }
 0x63a   : > { %v1428_v47 = vpop.f32.mrb[5].mxu0 }
 0x63d   : > { %v1769_v58 = vpop.f32.mrb[6].mxu0 }
 0x63e   : > { %v1438_v43 = vpop.f32.mrb[7].mxu0 }
 0x6b1   : > { %v1744_v5 = vpop.f32.mrb[0].mxu1 }
 0x6b2   : > { %v1414_v36 = vadd.f32 %v1760_v50, %v1744_v5  ;;  %v1268_v39 = vpop.f32.mrb[1].mxu1 }
 0x6b3   : > { %v1409_v31 = vadd.f32 %v1408_v28, %v1268_v39 }
 0x6b4   : > { %v1455_v25 = vadd.f32 %v1693_v0, %v1414_v36 }
 0x6b5   : > { %v1454_v38 = vadd.f32 %v1693_v0, %v1409_v31 }
 0x6b6   : > { %1463 = vst.msk [vmem:[%s362_s27 + $0x8] sm:$0xff] %vm1317_vm3, %v1455_v25 }
 0x6b7   : > { %1462 = vst.msk [vmem:[%s362_s27] sm:$0xff] %vm1317_vm3, %v1454_v38 }
 0x6b9   : > { %v1747_v48 = vpop.f32.mrb[2].mxu1 }
 0x6ba   : > { %v1424_v46 = vadd.f32 %v1763_v44, %v1747_v48  ;;  %v1278_v52 = vpop.f32.mrb[3].mxu1 }
 0x6bb   : > { %v1419_v53 = vadd.f32 %v1418_v45, %v1278_v52 }
 0x6bc   : > { %v1457_v54 = vadd.f32 %v1693_v0, %v1424_v46 }
 0x6bd   : > { %v1456_v42 = vadd.f32 %v1693_v0, %v1419_v53 }
 0x6be   : > { %1465 = vst.msk [vmem:[%s362_s27 + $0x18] sm:$0xff] %vm1317_vm3, %v1457_v54 }
 0x6bf   : > { %1464 = vst.msk [vmem:[%s362_s27 + $0x10] sm:$0xff] %vm1317_vm3, %v1456_v42 }
 0x6cc   : > { %v1750_v57 = vpop.f32.mrb[4].mxu1 }
 0x6cd   : > { %v1434_v37 = vadd.f32 %v1766_v35, %v1750_v57  ;;  %v1288_v60 = vpop.f32.mrb[5].mxu1 }
 0x6ce   : > { %v1429_v18 = vadd.f32 %v1428_v47, %v1288_v60 }
 0x6cf   : > { %v1459_v2 = vadd.f32 %v1693_v0, %v1434_v37 }
 0x6d0   : > { %v1458_v59 = vadd.f32 %v1693_v0, %v1429_v18 }
 0x6d1   : > { %1467 = vst.msk [vmem:[%s362_s27 + $0x28] sm:$0xff] %vm1317_vm3, %v1459_v2 }
 0x6d2   : > { %1466 = vst.msk [vmem:[%s362_s27 + $0x20] sm:$0xff] %vm1317_vm3, %v1458_v59 }
 0x6df   : > { %v1753_v3 = vpop.f32.mrb[6].mxu1 }
 0x6e0   : > { %v1444_v4 = vadd.f32 %v1769_v58, %v1753_v3  ;;  %v1298_v9 = vpop.f32.mrb[7].mxu1 }
 0x6e1   : > { %v1439_v7 = vadd.f32 %v1438_v43, %v1298_v9 }
 0x6e2   : > { %v1461_v8 = vadd.f32 %v1693_v0, %v1444_v4 }
 0x6e3   : > { %v1460_v10 = vadd.f32 %v1693_v0, %v1439_v7 }
 0x6e4   : > { %1469 = vst.msk [vmem:[%s362_s27 + $0x38] sm:$0xff] %vm1317_vm3, %v1461_v8 }
 0x6e5   : > { %1468 = vst.msk [vmem:[%s362_s27 + $0x30] sm:$0xff] %vm1317_vm3, %v1460_v10 }
 0x6e6 PF: > { %s16_s23 = sadd.s32 1, %s1895_s23   ;;  %s2437_s21 = smov %s1891_s22 }
 0x6e7   : > { %p13_p5 = scmp.ge.s32.totalorder %s16_s23, 4   ;;  %s2438_s22 = smov %s2440_s24 }
 0x6e9   :  { %15 = sbr.rel (!%p13_p5) target bundleno = 2 (0x2), region = 83 }

</bundles_post_ra>
